<compile_context>
chip_gen: v7x
topology: tpu7x:2x2x1
jax: 0.10.0
libtpu: 0.0.40
codegen_flags: <defaults>
</compile_context>

<pallas_src>
import functools
import math

import jax
import jax.numpy as jnp
from jax.experimental import pallas as pl
from jax.experimental.pallas import tpu as pltpu


_MASK_NEG = -1e9            # large finite additive mask (safer than float32 finfo.min)
_INNER_TILE_TARGET = 1024   # FFN intermediate-dim tile target (streams i_w / f_w)


@functools.lru_cache(maxsize=None)
def _tpu_config():
    """Generation-aware (vmem_limit_bytes, row-tile target).

    v5e/v6e: 128 MiB VMEM -> ~96 MiB scoped limit, 512-row tiles.
    v7x:      64 MiB VMEM -> ~48 MiB scoped limit, 256-row tiles.
    """
    vmem_cap = 64 * 1024 * 1024
    try:
        info = pltpu.get_tpu_info()
        vmem_cap = int(getattr(info, "vmem_capacity_bytes", vmem_cap))
    except Exception:
        pass
    vmem_limit = max(32 * 1024 * 1024, int(vmem_cap * 0.75))
    tm_target = 512 if vmem_cap > 96 * 1024 * 1024 else 256
    return vmem_limit, tm_target


def _round_up(x, m):
    return ((x + m - 1) // m) * m


def _pick_tm(m_rows):
    _, tm_target = _tpu_config()
    return min(tm_target, _round_up(m_rows, 8))


def _pick_inner(n, target=_INNER_TILE_TARGET):
    # Largest 128-multiple <= target that divides the intermediate dim (else full dim).
    if n <= target:
        return n
    t = (target // 128) * 128
    while t >= 128:
        if n % t == 0:
            return t
        t -= 128
    return n


def _pad_rows(x, m_pad):
    pad = m_pad - x.shape[0]
    return jnp.pad(x, ((0, pad), (0, 0))) if pad else x


def _params(dim_semantics):
    vmem_limit, _ = _tpu_config()
    return pltpu.CompilerParams(
        dimension_semantics=dim_semantics, vmem_limit_bytes=vmem_limit)


# ----------------------------------------------------------------------------
# Pallas kernels
# ----------------------------------------------------------------------------
def _add_ln_kernel(x_ref, r_ref, g_ref, b_ref, o_ref, *, eps):
    # LayerNorm(x + residual) over the hidden dim (embedding path), f32 math.
    x = x_ref[...].astype(jnp.float32) + r_ref[...].astype(jnp.float32)
    mu = jnp.mean(x, axis=-1, keepdims=True)
    var = jnp.mean((x - mu) * (x - mu), axis=-1, keepdims=True)
    y = (x - mu) * jax.lax.rsqrt(var + eps)
    o_ref[...] = (y * g_ref[...] + b_ref[...]).astype(o_ref.dtype)


def _dense_qkv_kernel(x_ref, w_ref, b_ref, q_ref, k_ref, v_ref):
    # Fused QKV projection; writes q/k/v as separate token-major [tm, H] tiles
    # (lane slices of the [tm, 3H] matmul result) -> no HBM split/transpose later.
    y = jnp.dot(x_ref[...], w_ref[...], preferred_element_type=jnp.float32)
    y = (y + b_ref[...]).astype(q_ref.dtype)
    h = q_ref.shape[1]
    q_ref[...] = y[:, :h]
    k_ref[...] = y[:, h:2 * h]
    v_ref[...] = y[:, 2 * h:3 * h]


def _dense_add_ln_kernel(x_ref, w_ref, b_ref, r_ref, g_ref, bb_ref, o_ref, *, eps):
    # Fused: LayerNorm(x @ w + b + residual) over the hidden dim, f32 math.
    y = jnp.dot(x_ref[...], w_ref[...], preferred_element_type=jnp.float32)
    y = y + b_ref[...] + r_ref[...].astype(jnp.float32)
    mu = jnp.mean(y, axis=-1, keepdims=True)
    var = jnp.mean((y - mu) * (y - mu), axis=-1, keepdims=True)
    y = (y - mu) * jax.lax.rsqrt(var + eps)
    o_ref[...] = (y * g_ref[...] + bb_ref[...]).astype(o_ref.dtype)


def _attention_kernel(q_ref, k_ref, v_ref, m_ref, o_ref, *, num_heads, scale):
    # One batch item per grid step. q/k/v blocks are (1, S, H) with heads folded onto
    # lanes; heads are split in-kernel via static lane slices (no HBM transposes) and
    # the output is written as one lane-dense (S, H) block.
    # TODO(synk): switch to a flash-style tiled softmax once S grows beyond ~1-2k.
    h_dim = q_ref.shape[2]
    dh = h_dim // num_heads
    mask = m_ref[0]                            # (1, S) additive, broadcast over queries
    q_all = q_ref[0]                           # (S, H) bf16
    k_all = k_ref[0]
    v_all = v_ref[0]
    ctxs = []
    for h in range(num_heads):                 # unrolled: head matmuls issue back-to-back
        sl = slice(h * dh, (h + 1) * dh)
        q = q_all[:, sl]                       # (S, Dh)
        k = k_all[:, sl]
        v = v_all[:, sl]
        s = jnp.einsum("qd,kd->qk", q, k,
                       preferred_element_type=jnp.float32) * scale   # (S, S) f32
        s = s + mask
        s = s - jnp.max(s, axis=-1, keepdims=True)
        s = jnp.exp(s)                         # in-place reuse of the score buffer
        s = s * pl.reciprocal(jnp.sum(s, axis=-1, keepdims=True), approx=True)
        ctx = jnp.dot(s.astype(v.dtype), v, preferred_element_type=jnp.float32)
        ctxs.append(ctx.astype(o_ref.dtype))   # (S, Dh)
    o_ref[0] = jnp.concatenate(ctxs, axis=-1)  # (S, H) single full-width store


def _ffn_kernel(x_ref, iw_ref, ib_ref, fw_ref, fb_ref, g_ref, bb_ref, o_ref,
                acc_ref, *, eps, approx_gelu):
    # Fused FFN: for each intermediate chunk j, GELU(x @ i_w[:, j] + i_b[j]) is kept in
    # VMEM and immediately contracted with f_w[j, :] into the f32 accumulator; the
    # intermediate never hits HBM. Last chunk adds bias + residual and applies LayerNorm.
    j = pl.program_id(1)

    @pl.when(j == 0)
    def _():
        acc_ref[...] = jnp.zeros_like(acc_ref)

    h = jnp.dot(x_ref[...], iw_ref[...], preferred_element_type=jnp.float32)
    h = h + ib_ref[...]
    if approx_gelu:
        h = jax.nn.gelu(h, approximate=True)   # tanh GELU -> EUP (use if VALU-bound)
    else:                                      # exact erf-GELU (HF BERT "gelu")
        h = 0.5 * h * (1.0 + jax.lax.erf(h * (1.0 / math.sqrt(2.0))))
    acc_ref[...] += jnp.dot(h.astype(x_ref.dtype), fw_ref[...],
                            preferred_element_type=jnp.float32)

    @pl.when(j == pl.num_programs(1) - 1)
    def _():
        y = acc_ref[...] + fb_ref[...] + x_ref[...].astype(jnp.float32)
        mu = jnp.mean(y, axis=-1, keepdims=True)
        var = jnp.mean((y - mu) * (y - mu), axis=-1, keepdims=True)
        y = (y - mu) * jax.lax.rsqrt(var + eps)
        o_ref[...] = (y * g_ref[...] + bb_ref[...]).astype(o_ref.dtype)


# ----------------------------------------------------------------------------
# Pallas wrappers
# ----------------------------------------------------------------------------
def add_layernorm(x, residual, gamma, beta, eps=1e-12):
    M, H = x.shape
    tm = _pick_tm(M)
    Mp = _round_up(M, tm)
    xp = _pad_rows(x, Mp)
    rp = _pad_rows(residual, Mp)
    out = pl.pallas_call(
        functools.partial(_add_ln_kernel, eps=eps),
        out_shape=jax.ShapeDtypeStruct((Mp, H), x.dtype),
        grid=(Mp // tm,),
        in_specs=[
            pl.BlockSpec((tm, H), lambda i: (i, 0)),
            pl.BlockSpec((tm, H), lambda i: (i, 0)),
            pl.BlockSpec((1, H), lambda i: (0, 0)),
            pl.BlockSpec((1, H), lambda i: (0, 0)),
        ],
        out_specs=pl.BlockSpec((tm, H), lambda i: (i, 0)),
        compiler_params=_params(("parallel",)),
    )(xp, rp, gamma.reshape(1, H), beta.reshape(1, H))
    return out[:M] if Mp != M else out


def dense_qkv(x, w, b):
    # x: (M, H) bf16, w: (H, 3H) bf16 -> q, k, v each (M, H) bf16 (token-major).
    M, H = x.shape
    N = w.shape[1]
    tm = _pick_tm(M)
    Mp = _round_up(M, tm)
    xp = _pad_rows(x, Mp)
    row_spec = pl.BlockSpec((tm, H), lambda i: (i, 0))
    q, k, v = pl.pallas_call(
        _dense_qkv_kernel,
        out_shape=tuple(jax.ShapeDtypeStruct((Mp, H), x.dtype) for _ in range(3)),
        grid=(Mp // tm,),
        in_specs=[
            pl.BlockSpec((tm, H), lambda i: (i, 0)),
            pl.BlockSpec((H, N), lambda i: (0, 0)),
            pl.BlockSpec((1, N), lambda i: (0, 0)),
        ],
        out_specs=(row_spec, row_spec, row_spec),
        compiler_params=_params(("parallel",)),
    )(xp, w, b.reshape(1, N))
    if Mp != M:
        q, k, v = q[:M], k[:M], v[:M]
    return q, k, v


def dense_add_layernorm(x, w, b, residual, gamma, beta, eps=1e-12):
    M, K = x.shape
    N = w.shape[1]
    tm = _pick_tm(M)
    Mp = _round_up(M, tm)
    xp = _pad_rows(x, Mp)
    rp = _pad_rows(residual, Mp)
    out = pl.pallas_call(
        functools.partial(_dense_add_ln_kernel, eps=eps),
        out_shape=jax.ShapeDtypeStruct((Mp, N), x.dtype),
        grid=(Mp // tm,),
        in_specs=[
            pl.BlockSpec((tm, K), lambda i: (i, 0)),
            pl.BlockSpec((K, N), lambda i: (0, 0)),
            pl.BlockSpec((1, N), lambda i: (0, 0)),
            pl.BlockSpec((tm, N), lambda i: (i, 0)),
            pl.BlockSpec((1, N), lambda i: (0, 0)),
            pl.BlockSpec((1, N), lambda i: (0, 0)),
        ],
        out_specs=pl.BlockSpec((tm, N), lambda i: (i, 0)),
        compiler_params=_params(("parallel",)),
    )(xp, w, b.reshape(1, N), rp, gamma.reshape(1, N), beta.reshape(1, N))
    return out[:M] if Mp != M else out


def attention(q, k, v, ext_mask, num_heads, scale):
    # q/k/v: (B, S, H) bf16 token-major (heads on lanes); ext_mask: (B, 1, S) f32 additive.
    B, S, H = q.shape
    qkv_spec = pl.BlockSpec((1, S, H), lambda b: (b, 0, 0))
    return pl.pallas_call(
        functools.partial(_attention_kernel, num_heads=num_heads, scale=scale),
        out_shape=jax.ShapeDtypeStruct((B, S, H), q.dtype),
        grid=(B,),
        in_specs=[qkv_spec, qkv_spec, qkv_spec,
                  pl.BlockSpec((1, 1, S), lambda b: (b, 0, 0))],
        out_specs=pl.BlockSpec((1, S, H), lambda b: (b, 0, 0)),
        compiler_params=_params(("parallel",)),
    )(q, k, v, ext_mask)


def ffn_fused(x, i_w, i_b, f_w, f_b, gamma, beta, eps=1e-12, approx_gelu=False):
    # LayerNorm(GELU(x @ i_w + i_b) @ f_w + f_b + x) without writing the intermediate
    # to HBM; intermediate dim streamed in ti-sized chunks (reduction grid axis).
    M, H = x.shape
    I = i_w.shape[1]
    tm = _pick_tm(M)
    Mp = _round_up(M, tm)
    xp = _pad_rows(x, Mp)
    ti = _pick_inner(I)
    out = pl.pallas_call(
        functools.partial(_ffn_kernel, eps=eps, approx_gelu=approx_gelu),
        out_shape=jax.ShapeDtypeStruct((Mp, H), x.dtype),
        grid=(Mp // tm, I // ti),
        in_specs=[
            pl.BlockSpec((tm, H), lambda i, j: (i, 0)),
            pl.BlockSpec((H, ti), lambda i, j: (0, j)),
            pl.BlockSpec((1, ti), lambda i, j: (0, j)),
            pl.BlockSpec((ti, H), lambda i, j: (j, 0)),
            pl.BlockSpec((1, H), lambda i, j: (0, 0)),
            pl.BlockSpec((1, H), lambda i, j: (0, 0)),
            pl.BlockSpec((1, H), lambda i, j: (0, 0)),
        ],
        out_specs=pl.BlockSpec((tm, H), lambda i, j: (i, 0)),
        scratch_shapes=[pltpu.VMEM((tm, H), jnp.float32)],
        compiler_params=_params(("parallel", "arbitrary")),
    )(xp, i_w, i_b.reshape(1, I), f_w, f_b.reshape(1, H),
      gamma.reshape(1, H), beta.reshape(1, H))
    return out[:M] if Mp != M else out


# ----------------------------------------------------------------------------
# Model (parameters + forward)
# ----------------------------------------------------------------------------
def init_params(key, *, hidden, num_heads, intermediate, num_layers,
                num_classes, max_pos, type_vocab):
    std = 0.02
    keys = iter(jax.random.split(key, 8 + num_layers * 4))

    def w(shape, dtype=jnp.bfloat16):
        return (jax.random.normal(next(keys), shape, jnp.float32) * std).astype(dtype)

    params = {
        "token_type_emb": w((type_vocab, hidden), jnp.float32),
        "position_emb": w((max_pos, hidden), jnp.float32),
        "emb_ln_g": jnp.ones((hidden,), jnp.float32),
        "emb_ln_b": jnp.zeros((hidden,), jnp.float32),
        "pooler_w": w((hidden, hidden), jnp.float32),
        "pooler_b": jnp.zeros((hidden,), jnp.float32),
        "fc_w": w((hidden, num_classes), jnp.float32),
        "fc_b": jnp.zeros((num_classes,), jnp.float32),
        "layers": [],
    }
    for _ in range(num_layers):
        layer = {
            "qkv_w": w((hidden, 3 * hidden)),          # fused Q/K/V projection [H, 3H]
            "qkv_b": jnp.zeros((3 * hidden,), jnp.float32),
            "o_w": w((hidden, hidden)),
            "o_b": jnp.zeros((hidden,), jnp.float32),
            "ln1_g": jnp.ones((hidden,), jnp.float32),
            "ln1_b": jnp.zeros((hidden,), jnp.float32),
            "i_w": w((hidden, intermediate)),
            "i_b": jnp.zeros((intermediate,), jnp.float32),
            "f_w": w((intermediate, hidden)),
            "f_b": jnp.zeros((hidden,), jnp.float32),
            "ln2_g": jnp.ones((hidden,), jnp.float32),
            "ln2_b": jnp.zeros((hidden,), jnp.float32),
        }
        params["layers"].append(layer)
    return params


def bert_classifier_forward(params, inputs_embeds, attention_mask,
                            token_type_ids=None, *, num_heads):
    B, S, H = inputs_embeds.shape
    Dh = H // num_heads
    scale = 1.0 / math.sqrt(Dh)
    cdt = jnp.bfloat16

    if token_type_ids is None:
        token_type_ids = jnp.zeros((B, S), jnp.int32)

    # ---- BertEmbeddings applied to inputs_embeds (as in the reference forward) ----
    tok_type_emb = jnp.take(params["token_type_emb"], token_type_ids, axis=0)   # (B,S,H)
    pos_emb = params["position_emb"][:S][None, :, :]                            # (1,S,H)
    extra = (tok_type_emb + pos_emb).reshape(B * S, H).astype(cdt)
    x = add_layernorm(inputs_embeds.reshape(B * S, H).astype(cdt), extra,
                      params["emb_ln_g"], params["emb_ln_b"])                   # (B*S,H) bf16
    # dropout(p=0.1) -> identity (inference)

    # ---- extended additive attention mask, per-batch only, finite constant ----
    ext = (1.0 - attention_mask.astype(jnp.float32))[:, None, :] * _MASK_NEG    # (B,1,S)

    # ---- encoder layers ----
    for layer in params["layers"]:
        h = x
        # Fused QKV matmul writes token-major q/k/v (no HBM split / head transposes).
        q, k, v = dense_qkv(h, layer["qkv_w"], layer["qkv_b"])                  # (B*S, H) x3
        ctx = attention(q.reshape(B, S, H), k.reshape(B, S, H), v.reshape(B, S, H),
                        ext, num_heads, scale)                                  # (B, S, H)
        # o-proj with fused residual-add + LayerNorm epilogue (lane-dense input/output).
        x = dense_add_layernorm(ctx.reshape(B * S, H), layer["o_w"], layer["o_b"], h,
                                layer["ln1_g"], layer["ln1_b"])
        # Fully fused FFN (GELU up-proj + down-proj + residual + LayerNorm).
        x = ffn_fused(x, layer["i_w"], layer["i_b"], layer["f_w"], layer["f_b"],
                      layer["ln2_g"], layer["ln2_b"])

    # ---- pooler (CLS -> dense -> tanh) + classifier in plain JAX (tiny N) ----
    cls = x.reshape(B, S, H)[:, 0, :].astype(jnp.float32)                       # (B, H)
    pooled = jnp.tanh(cls @ params["pooler_w"] + params["pooler_b"])
    # dropout(p=0.3) -> identity (inference)
    logits = pooled @ params["fc_w"] + params["fc_b"]                           # (B, C) f32
    return logits


# ----------------------------------------------------------------------------
# Driver
# ----------------------------------------------------------------------------
if __name__ == "__main__":
    B, S, H = 2, 8, 32
    NUM_HEADS = 4
    INTERMEDIATE = 128
    NUM_LAYERS = 2
    NUM_CLASSES = 2

    root = jax.random.PRNGKey(0)
    k_param, k_emb = jax.random.split(root)

    params = init_params(
        k_param, hidden=H, num_heads=NUM_HEADS, intermediate=INTERMEDIATE,
        num_layers=NUM_LAYERS, num_classes=NUM_CLASSES, max_pos=16, type_vocab=2)

    inputs_embeds = jax.random.normal(k_emb, (B, S, H), jnp.float32)
    attention_mask = jnp.ones((B, S), jnp.int32)
    token_type_ids = jnp.zeros((B, S), jnp.int32)

    fwd = jax.jit(functools.partial(bert_classifier_forward, num_heads=NUM_HEADS))
    logits = fwd(params, inputs_embeds, attention_mask, token_type_ids)
    jax.block_until_ready(logits)

    assert logits.shape == (B, NUM_CLASSES) and logits.dtype == jnp.float32
    print("KERNEL_OK")
</pallas_src>

<mosaic_0001>
module attributes {stable_mosaic.version = 11 : i64} {
  func.func @_add_ln_kernel(%arg0: i32, %arg1: memref<16x32xbf16, #tpu.memory_space<vmem>>, %arg2: memref<16x32xbf16, #tpu.memory_space<vmem>>, %arg3: memref<1x32xf32, #tpu.memory_space<vmem>>, %arg4: memref<1x32xf32, #tpu.memory_space<vmem>>, %arg5: memref<16x32xbf16, #tpu.memory_space<vmem>>) attributes {dimension_semantics = [#tpu.dimension_semantics<parallel>], iteration_bounds = array<i64: 1>, scalar_prefetch = 0 : i64, scratch_operands = 0 : i64, tpu.core_type = #tpu.core_type<tc>, window_params = [{transform_indices = @transform_0, window_bounds = array<i64: 16, 32>}, {transform_indices = @transform_1, window_bounds = array<i64: 16, 32>}, {pipeline_mode = #tpu.pipeline_mode<synchronous>, transform_indices = @transform_2, window_bounds = array<i64: 1, 32>}, {pipeline_mode = #tpu.pipeline_mode<synchronous>, transform_indices = @transform_3, window_bounds = array<i64: 1, 32>}, {transform_indices = @transform_4, window_bounds = array<i64: 16, 32>}]} {
    %c0 = arith.constant 0 : index
    %c0_0 = arith.constant 0 : index
    %0 = vector.load %arg1[%c0, %c0_0] : memref<16x32xbf16, #tpu.memory_space<vmem>>, vector<16x32xbf16>
    %1 = arith.extf %0 : vector<16x32xbf16> to vector<16x32xf32>
    %c0_1 = arith.constant 0 : index
    %c0_2 = arith.constant 0 : index
    %2 = vector.load %arg2[%c0_1, %c0_2] : memref<16x32xbf16, #tpu.memory_space<vmem>>, vector<16x32xbf16>
    %3 = arith.extf %2 : vector<16x32xbf16> to vector<16x32xf32>
    %4 = arith.addf %1, %3 : vector<16x32xf32>
    %cst = arith.constant dense<0.000000e+00> : vector<16xf32>
    %5 = vector.multi_reduction <add>, %4, %cst [1] : vector<16x32xf32> to vector<16xf32>
    %6 = vector.shape_cast %5 : vector<16xf32> to vector<16x1xf32>
    %cst_3 = arith.constant 3.200000e+01 : f32
    %7 = vector.broadcast %cst_3 : f32 to vector<16x1xf32>
    %8 = arith.divf %6, %7 : vector<16x1xf32>
    %9 = vector.broadcast %8 : vector<16x1xf32> to vector<16x32xf32>
    %10 = arith.subf %4, %9 : vector<16x32xf32>
    %11 = vector.broadcast %8 : vector<16x1xf32> to vector<16x32xf32>
    %12 = arith.subf %4, %11 : vector<16x32xf32>
    %13 = arith.mulf %10, %12 : vector<16x32xf32>
    %cst_4 = arith.constant dense<0.000000e+00> : vector<16xf32>
    %14 = vector.multi_reduction <add>, %13, %cst_4 [1] : vector<16x32xf32> to vector<16xf32>
    %15 = vector.shape_cast %14 : vector<16xf32> to vector<16x1xf32>
    %cst_5 = arith.constant 3.200000e+01 : f32
    %16 = vector.broadcast %cst_5 : f32 to vector<16x1xf32>
    %17 = arith.divf %15, %16 : vector<16x1xf32>
    %18 = vector.broadcast %8 : vector<16x1xf32> to vector<16x32xf32>
    %19 = arith.subf %4, %18 : vector<16x32xf32>
    %cst_6 = arith.constant 9.99999996E-13 : f32
    %20 = vector.broadcast %cst_6 : f32 to vector<16x1xf32>
    %21 = arith.addf %17, %20 : vector<16x1xf32>
    %22 = math.rsqrt %21 : vector<16x1xf32>
    %23 = vector.broadcast %22 : vector<16x1xf32> to vector<16x32xf32>
    %24 = arith.mulf %19, %23 : vector<16x32xf32>
    %c0_7 = arith.constant 0 : index
    %c0_8 = arith.constant 0 : index
    %25 = vector.load %arg3[%c0_7, %c0_8] : memref<1x32xf32, #tpu.memory_space<vmem>>, vector<1x32xf32>
    %26 = vector.broadcast %25 : vector<1x32xf32> to vector<16x32xf32>
    %27 = arith.mulf %24, %26 : vector<16x32xf32>
    %c0_9 = arith.constant 0 : index
    %c0_10 = arith.constant 0 : index
    %28 = vector.load %arg4[%c0_9, %c0_10] : memref<1x32xf32, #tpu.memory_space<vmem>>, vector<1x32xf32>
    %29 = vector.broadcast %28 : vector<1x32xf32> to vector<16x32xf32>
    %30 = arith.addf %27, %29 : vector<16x32xf32>
    %31 = arith.truncf %30 : vector<16x32xf32> to vector<16x32xbf16>
    %c0_11 = arith.constant 0 : index
    %c0_12 = arith.constant 0 : index
    %32 = vector.load %arg5[%c0_11, %c0_12] : memref<16x32xbf16, #tpu.memory_space<vmem>>, vector<16x32xbf16>
    tpu.vector_store %arg5[%c0_11, %c0_12], %31 {strides = array<i32>} : memref<16x32xbf16, #tpu.memory_space<vmem>>, vector<16x32xbf16>,
    return
  }
  func.func @transform_0(%arg0: i32) -> (i32, i32) {
    %c0_i32 = arith.constant 0 : i32
    %c0_i32_0 = arith.constant 0 : i32
    return %arg0, %c0_i32 : i32, i32
  }
  func.func @transform_1(%arg0: i32) -> (i32, i32) {
    %c0_i32 = arith.constant 0 : i32
    %c0_i32_0 = arith.constant 0 : i32
    return %arg0, %c0_i32 : i32, i32
  }
  func.func @transform_2(%arg0: i32) -> (i32, i32) {
    %c0_i32 = arith.constant 0 : i32
    %c0_i32_0 = arith.constant 0 : i32
    %c0_i32_1 = arith.constant 0 : i32
    return %c0_i32, %c0_i32_0 : i32, i32
  }
  func.func @transform_3(%arg0: i32) -> (i32, i32) {
    %c0_i32 = arith.constant 0 : i32
    %c0_i32_0 = arith.constant 0 : i32
    %c0_i32_1 = arith.constant 0 : i32
    return %c0_i32, %c0_i32_0 : i32, i32
  }
  func.func @transform_4(%arg0: i32) -> (i32, i32) {
    %c0_i32 = arith.constant 0 : i32
    %c0_i32_0 = arith.constant 0 : i32
    return %arg0, %c0_i32 : i32, i32
  }
}

module attributes {stable_mosaic.version = 11 : i64} {
  func.func @_dense_qkv_kernel(%arg0: i32, %arg1: memref<16x32xbf16, #tpu.memory_space<vmem>>, %arg2: memref<32x96xbf16, #tpu.memory_space<vmem>>, %arg3: memref<1x96xf32, #tpu.memory_space<vmem>>, %arg4: memref<16x32xbf16, #tpu.memory_space<vmem>>, %arg5: memref<16x32xbf16, #tpu.memory_space<vmem>>, %arg6: memref<16x32xbf16, #tpu.memory_space<vmem>>) attributes {dimension_semantics = [#tpu.dimension_semantics<parallel>], iteration_bounds = array<i64: 1>, scalar_prefetch = 0 : i64, scratch_operands = 0 : i64, tpu.core_type = #tpu.core_type<tc>, window_params = [{transform_indices = @transform_0, window_bounds = array<i64: 16, 32>}, {pipeline_mode = #tpu.pipeline_mode<synchronous>, transform_indices = @transform_1, window_bounds = array<i64: 32, 96>}, {pipeline_mode = #tpu.pipeline_mode<synchronous>, transform_indices = @transform_2, window_bounds = array<i64: 1, 96>}, {transform_indices = @transform_3, window_bounds = array<i64: 16, 32>}, {transform_indices = @transform_4, window_bounds = array<i64: 16, 32>}, {transform_indices = @transform_5, window_bounds = array<i64: 16, 32>}]} {
    %c0 = arith.constant 0 : index
    %c0_0 = arith.constant 0 : index
    %0 = vector.load %arg1[%c0, %c0_0] : memref<16x32xbf16, #tpu.memory_space<vmem>>, vector<16x32xbf16>
    %c0_1 = arith.constant 0 : index
    %c0_2 = arith.constant 0 : index
    %1 = vector.load %arg2[%c0_1, %c0_2] : memref<32x96xbf16, #tpu.memory_space<vmem>>, vector<32x96xbf16>
    %cst = arith.constant dense<0.000000e+00> : vector<16x96xf32>
    %2 = tpu.matmul %0, %1, %cst {dimension_numbers = #tpu.dot_dimension_numbers<[1], [0], [0], [1], [0, 0, 1, 1], [], []>} : vector<16x32xbf16>, vector<32x96xbf16>, vector<16x96xf32> -> vector<16x96xf32>
    %c0_3 = arith.constant 0 : index
    %c0_4 = arith.constant 0 : index
    %3 = vector.load %arg3[%c0_3, %c0_4] : memref<1x96xf32, #tpu.memory_space<vmem>>, vector<1x96xf32>
    %4 = vector.broadcast %3 : vector<1x96xf32> to vector<16x96xf32>
    %5 = arith.addf %2, %4 : vector<16x96xf32>
    %6 = arith.truncf %5 : vector<16x96xf32> to vector<16x96xbf16>
    %7 = vector.extract_strided_slice %6 {offsets = [0, 0], sizes = [16, 32], strides = [1, 1]} : vector<16x96xbf16> to vector<16x32xbf16>
    %c0_5 = arith.constant 0 : index
    %c0_6 = arith.constant 0 : index
    %8 = vector.load %arg4[%c0_5, %c0_6] : memref<16x32xbf16, #tpu.memory_space<vmem>>, vector<16x32xbf16>
    tpu.vector_store %arg4[%c0_5, %c0_6], %7 {strides = array<i32>} : memref<16x32xbf16, #tpu.memory_space<vmem>>, vector<16x32xbf16>,
    %9 = vector.extract_strided_slice %6 {offsets = [0, 32], sizes = [16, 32], strides = [1, 1]} : vector<16x96xbf16> to vector<16x32xbf16>
    %c0_7 = arith.constant 0 : index
    %c0_8 = arith.constant 0 : index
    %10 = vector.load %arg5[%c0_7, %c0_8] : memref<16x32xbf16, #tpu.memory_space<vmem>>, vector<16x32xbf16>
    tpu.vector_store %arg5[%c0_7, %c0_8], %9 {strides = array<i32>} : memref<16x32xbf16, #tpu.memory_space<vmem>>, vector<16x32xbf16>,
    %11 = vector.extract_strided_slice %6 {offsets = [0, 64], sizes = [16, 32], strides = [1, 1]} : vector<16x96xbf16> to vector<16x32xbf16>
    %c0_9 = arith.constant 0 : index
    %c0_10 = arith.constant 0 : index
    %12 = vector.load %arg6[%c0_9, %c0_10] : memref<16x32xbf16, #tpu.memory_space<vmem>>, vector<16x32xbf16>
    tpu.vector_store %arg6[%c0_9, %c0_10], %11 {strides = array<i32>} : memref<16x32xbf16, #tpu.memory_space<vmem>>, vector<16x32xbf16>,
    return
  }
  func.func @transform_0(%arg0: i32) -> (i32, i32) {
    %c0_i32 = arith.constant 0 : i32
    %c0_i32_0 = arith.constant 0 : i32
    return %arg0, %c0_i32 : i32, i32
  }
  func.func @transform_1(%arg0: i32) -> (i32, i32) {
    %c0_i32 = arith.constant 0 : i32
    %c0_i32_0 = arith.constant 0 : i32
    %c0_i32_1 = arith.constant 0 : i32
    return %c0_i32, %c0_i32_0 : i32, i32
  }
  func.func @transform_2(%arg0: i32) -> (i32, i32) {
    %c0_i32 = arith.constant 0 : i32
    %c0_i32_0 = arith.constant 0 : i32
    %c0_i32_1 = arith.constant 0 : i32
    return %c0_i32, %c0_i32_0 : i32, i32
  }
  func.func @transform_3(%arg0: i32) -> (i32, i32) {
    %c0_i32 = arith.constant 0 : i32
    %c0_i32_0 = arith.constant 0 : i32
    return %arg0, %c0_i32 : i32, i32
  }
  func.func @transform_4(%arg0: i32) -> (i32, i32) {
    %c0_i32 = arith.constant 0 : i32
    %c0_i32_0 = arith.constant 0 : i32
    return %arg0, %c0_i32 : i32, i32
  }
  func.func @transform_5(%arg0: i32) -> (i32, i32) {
    %c0_i32 = arith.constant 0 : i32
    %c0_i32_0 = arith.constant 0 : i32
    return %arg0, %c0_i32 : i32, i32
  }
}

module attributes {stable_mosaic.version = 11 : i64} {
  func.func @_dense_add_ln_kernel(%arg0: i32, %arg1: memref<16x32xbf16, #tpu.memory_space<vmem>>, %arg2: memref<32x32xbf16, #tpu.memory_space<vmem>>, %arg3: memref<1x32xf32, #tpu.memory_space<vmem>>, %arg4: memref<16x32xbf16, #tpu.memory_space<vmem>>, %arg5: memref<1x32xf32, #tpu.memory_space<vmem>>, %arg6: memref<1x32xf32, #tpu.memory_space<vmem>>, %arg7: memref<16x32xbf16, #tpu.memory_space<vmem>>) attributes {dimension_semantics = [#tpu.dimension_semantics<parallel>], iteration_bounds = array<i64: 1>, scalar_prefetch = 0 : i64, scratch_operands = 0 : i64, tpu.core_type = #tpu.core_type<tc>, window_params = [{transform_indices = @transform_0, window_bounds = array<i64: 16, 32>}, {pipeline_mode = #tpu.pipeline_mode<synchronous>, transform_indices = @transform_1, window_bounds = array<i64: 32, 32>}, {pipeline_mode = #tpu.pipeline_mode<synchronous>, transform_indices = @transform_2, window_bounds = array<i64: 1, 32>}, {transform_indices = @transform_3, window_bounds = array<i64: 16, 32>}, {pipeline_mode = #tpu.pipeline_mode<synchronous>, transform_indices = @transform_4, window_bounds = array<i64: 1, 32>}, {pipeline_mode = #tpu.pipeline_mode<synchronous>, transform_indices = @transform_5, window_bounds = array<i64: 1, 32>}, {transform_indices = @transform_6, window_bounds = array<i64: 16, 32>}]} {
    %c0 = arith.constant 0 : index
    %c0_0 = arith.constant 0 : index
    %0 = vector.load %arg1[%c0, %c0_0] : memref<16x32xbf16, #tpu.memory_space<vmem>>, vector<16x32xbf16>
    %c0_1 = arith.constant 0 : index
    %c0_2 = arith.constant 0 : index
    %1 = vector.load %arg2[%c0_1, %c0_2] : memref<32x32xbf16, #tpu.memory_space<vmem>>, vector<32x32xbf16>
    %cst = arith.constant dense<0.000000e+00> : vector<16x32xf32>
    %2 = tpu.matmul %0, %1, %cst {dimension_numbers = #tpu.dot_dimension_numbers<[1], [0], [0], [1], [0, 0, 1, 1], [], []>} : vector<16x32xbf16>, vector<32x32xbf16>, vector<16x32xf32> -> vector<16x32xf32>
    %c0_3 = arith.constant 0 : index
    %c0_4 = arith.constant 0 : index
    %3 = vector.load %arg3[%c0_3, %c0_4] : memref<1x32xf32, #tpu.memory_space<vmem>>, vector<1x32xf32>
    %4 = vector.broadcast %3 : vector<1x32xf32> to vector<16x32xf32>
    %5 = arith.addf %2, %4 : vector<16x32xf32>
    %c0_5 = arith.constant 0 : index
    %c0_6 = arith.constant 0 : index
    %6 = vector.load %arg4[%c0_5, %c0_6] : memref<16x32xbf16, #tpu.memory_space<vmem>>, vector<16x32xbf16>
    %7 = arith.extf %6 : vector<16x32xbf16> to vector<16x32xf32>
    %8 = arith.addf %5, %7 : vector<16x32xf32>
    %cst_7 = arith.constant dense<0.000000e+00> : vector<16xf32>
    %9 = vector.multi_reduction <add>, %8, %cst_7 [1] : vector<16x32xf32> to vector<16xf32>
    %10 = vector.shape_cast %9 : vector<16xf32> to vector<16x1xf32>
    %cst_8 = arith.constant 3.200000e+01 : f32
    %11 = vector.broadcast %cst_8 : f32 to vector<16x1xf32>
    %12 = arith.divf %10, %11 : vector<16x1xf32>
    %13 = vector.broadcast %12 : vector<16x1xf32> to vector<16x32xf32>
    %14 = arith.subf %8, %13 : vector<16x32xf32>
    %15 = vector.broadcast %12 : vector<16x1xf32> to vector<16x32xf32>
    %16 = arith.subf %8, %15 : vector<16x32xf32>
    %17 = arith.mulf %14, %16 : vector<16x32xf32>
    %cst_9 = arith.constant dense<0.000000e+00> : vector<16xf32>
    %18 = vector.multi_reduction <add>, %17, %cst_9 [1] : vector<16x32xf32> to vector<16xf32>
    %19 = vector.shape_cast %18 : vector<16xf32> to vector<16x1xf32>
    %cst_10 = arith.constant 3.200000e+01 : f32
    %20 = vector.broadcast %cst_10 : f32 to vector<16x1xf32>
    %21 = arith.divf %19, %20 : vector<16x1xf32>
    %22 = vector.broadcast %12 : vector<16x1xf32> to vector<16x32xf32>
    %23 = arith.subf %8, %22 : vector<16x32xf32>
    %cst_11 = arith.constant 9.99999996E-13 : f32
    %24 = vector.broadcast %cst_11 : f32 to vector<16x1xf32>
    %25 = arith.addf %21, %24 : vector<16x1xf32>
    %26 = math.rsqrt %25 : vector<16x1xf32>
    %27 = vector.broadcast %26 : vector<16x1xf32> to vector<16x32xf32>
    %28 = arith.mulf %23, %27 : vector<16x32xf32>
    %c0_12 = arith.constant 0 : index
    %c0_13 = arith.constant 0 : index
    %29 = vector.load %arg5[%c0_12, %c0_13] : memref<1x32xf32, #tpu.memory_space<vmem>>, vector<1x32xf32>
    %30 = vector.broadcast %29 : vector<1x32xf32> to vector<16x32xf32>
    %31 = arith.mulf %28, %30 : vector<16x32xf32>
    %c0_14 = arith.constant 0 : index
    %c0_15 = arith.constant 0 : index
    %32 = vector.load %arg6[%c0_14, %c0_15] : memref<1x32xf32, #tpu.memory_space<vmem>>, vector<1x32xf32>
    %33 = vector.broadcast %32 : vector<1x32xf32> to vector<16x32xf32>
    %34 = arith.addf %31, %33 : vector<16x32xf32>
    %35 = arith.truncf %34 : vector<16x32xf32> to vector<16x32xbf16>
    %c0_16 = arith.constant 0 : index
    %c0_17 = arith.constant 0 : index
    %36 = vector.load %arg7[%c0_16, %c0_17] : memref<16x32xbf16, #tpu.memory_space<vmem>>, vector<16x32xbf16>
    tpu.vector_store %arg7[%c0_16, %c0_17], %35 {strides = array<i32>} : memref<16x32xbf16, #tpu.memory_space<vmem>>, vector<16x32xbf16>,
    return
  }
  func.func @transform_0(%arg0: i32) -> (i32, i32) {
    %c0_i32 = arith.constant 0 : i32
    %c0_i32_0 = arith.constant 0 : i32
    return %arg0, %c0_i32 : i32, i32
  }
  func.func @transform_1(%arg0: i32) -> (i32, i32) {
    %c0_i32 = arith.constant 0 : i32
    %c0_i32_0 = arith.constant 0 : i32
    %c0_i32_1 = arith.constant 0 : i32
    return %c0_i32, %c0_i32_0 : i32, i32
  }
  func.func @transform_2(%arg0: i32) -> (i32, i32) {
    %c0_i32 = arith.constant 0 : i32
    %c0_i32_0 = arith.constant 0 : i32
    %c0_i32_1 = arith.constant 0 : i32
    return %c0_i32, %c0_i32_0 : i32, i32
  }
  func.func @transform_3(%arg0: i32) -> (i32, i32) {
    %c0_i32 = arith.constant 0 : i32
    %c0_i32_0 = arith.constant 0 : i32
    return %arg0, %c0_i32 : i32, i32
  }
  func.func @transform_4(%arg0: i32) -> (i32, i32) {
    %c0_i32 = arith.constant 0 : i32
    %c0_i32_0 = arith.constant 0 : i32
    %c0_i32_1 = arith.constant 0 : i32
    return %c0_i32, %c0_i32_0 : i32, i32
  }
  func.func @transform_5(%arg0: i32) -> (i32, i32) {
    %c0_i32 = arith.constant 0 : i32
    %c0_i32_0 = arith.constant 0 : i32
    %c0_i32_1 = arith.constant 0 : i32
    return %c0_i32, %c0_i32_0 : i32, i32
  }
  func.func @transform_6(%arg0: i32) -> (i32, i32) {
    %c0_i32 = arith.constant 0 : i32
    %c0_i32_0 = arith.constant 0 : i32
    return %arg0, %c0_i32 : i32, i32
  }
}

module attributes {stable_mosaic.version = 11 : i64} {
  func.func @_attention_kernel(%arg0: i32, %arg1: memref<1x8x32xbf16, #tpu.memory_space<vmem>>, %arg2: memref<1x8x32xbf16, #tpu.memory_space<vmem>>, %arg3: memref<1x8x32xbf16, #tpu.memory_space<vmem>>, %arg4: memref<1x1x8xf32, #tpu.memory_space<vmem>>, %arg5: memref<1x8x32xbf16, #tpu.memory_space<vmem>>) attributes {dimension_semantics = [#tpu.dimension_semantics<parallel>], iteration_bounds = array<i64: 2>, scalar_prefetch = 0 : i64, scratch_operands = 0 : i64, tpu.core_type = #tpu.core_type<tc>, window_params = [{transform_indices = @transform_0, window_bounds = array<i64: 1, 8, 32>}, {transform_indices = @transform_1, window_bounds = array<i64: 1, 8, 32>}, {transform_indices = @transform_2, window_bounds = array<i64: 1, 8, 32>}, {transform_indices = @transform_3, window_bounds = array<i64: 1, 1, 8>}, {transform_indices = @transform_4, window_bounds = array<i64: 1, 8, 32>}]} {
    %c0 = arith.constant 0 : index
    %c0_0 = arith.constant 0 : index
    %c0_1 = arith.constant 0 : index
    %0 = vector.load %arg4[%c0, %c0_0, %c0_1] : memref<1x1x8xf32, #tpu.memory_space<vmem>>, vector<1x1x8xf32>
    %1 = vector.shape_cast %0 : vector<1x1x8xf32> to vector<1x8xf32>
    %c0_2 = arith.constant 0 : index
    %c0_3 = arith.constant 0 : index
    %c0_4 = arith.constant 0 : index
    %2 = vector.load %arg1[%c0_2, %c0_3, %c0_4] : memref<1x8x32xbf16, #tpu.memory_space<vmem>>, vector<1x8x32xbf16>
    %3 = vector.shape_cast %2 : vector<1x8x32xbf16> to vector<8x32xbf16>
    %c0_5 = arith.constant 0 : index
    %c0_6 = arith.constant 0 : index
    %c0_7 = arith.constant 0 : index
    %4 = vector.load %arg2[%c0_5, %c0_6, %c0_7] : memref<1x8x32xbf16, #tpu.memory_space<vmem>>, vector<1x8x32xbf16>
    %5 = vector.shape_cast %4 : vector<1x8x32xbf16> to vector<8x32xbf16>
    %c0_8 = arith.constant 0 : index
    %c0_9 = arith.constant 0 : index
    %c0_10 = arith.constant 0 : index
    %6 = vector.load %arg3[%c0_8, %c0_9, %c0_10] : memref<1x8x32xbf16, #tpu.memory_space<vmem>>, vector<1x8x32xbf16>
    %7 = vector.shape_cast %6 : vector<1x8x32xbf16> to vector<8x32xbf16>
    %8 = vector.extract_strided_slice %3 {offsets = [0, 0], sizes = [8, 8], strides = [1, 1]} : vector<8x32xbf16> to vector<8x8xbf16>
    %9 = vector.extract_strided_slice %5 {offsets = [0, 0], sizes = [8, 8], strides = [1, 1]} : vector<8x32xbf16> to vector<8x8xbf16>
    %10 = vector.extract_strided_slice %7 {offsets = [0, 0], sizes = [8, 8], strides = [1, 1]} : vector<8x32xbf16> to vector<8x8xbf16>
    "tpu.trace_start"() <{level = 10 : i32, message = "qd,kd->qk"}> : () -> ()
    %cst = arith.constant dense<0.000000e+00> : vector<8x8xf32>
    %11 = tpu.matmul %8, %9, %cst {dimension_numbers = #tpu.dot_dimension_numbers<[1], [1], [0], [0], [0, 0, 1, 0], [], []>} : vector<8x8xbf16>, vector<8x8xbf16>, vector<8x8xf32> -> vector<8x8xf32>
    "tpu.trace_stop"() : () -> ()
    %cst_11 = arith.constant 0.353553385 : f32
    %12 = vector.broadcast %cst_11 : f32 to vector<8x8xf32>
    %13 = arith.mulf %11, %12 : vector<8x8xf32>
    %14 = vector.broadcast %1 : vector<1x8xf32> to vector<8x8xf32>
    %15 = arith.addf %13, %14 : vector<8x8xf32>
    %cst_12 = arith.constant dense<0xFF800000> : vector<8xf32>
    %16 = vector.multi_reduction <maximumf>, %15, %cst_12 [1] : vector<8x8xf32> to vector<8xf32>
    %17 = vector.shape_cast %16 : vector<8xf32> to vector<8x1xf32>
    %18 = vector.broadcast %17 : vector<8x1xf32> to vector<8x8xf32>
    %19 = arith.subf %15, %18 : vector<8x8xf32>
    %20 = math.exp %19 : vector<8x8xf32>
    %cst_13 = arith.constant dense<0.000000e+00> : vector<8xf32>
    %21 = vector.multi_reduction <add>, %20, %cst_13 [1] : vector<8x8xf32> to vector<8xf32>
    %22 = vector.shape_cast %21 : vector<8xf32> to vector<8x1xf32>
    %23 = tpu.reciprocal %22 {approx = true} : vector<8x1xf32> -> vector<8x1xf32>
    %24 = vector.broadcast %23 : vector<8x1xf32> to vector<8x8xf32>
    %25 = arith.mulf %20, %24 : vector<8x8xf32>
    %26 = arith.truncf %25 : vector<8x8xf32> to vector<8x8xbf16>
    %cst_14 = arith.constant dense<0.000000e+00> : vector<8x8xf32>
    %27 = tpu.matmul %26, %10, %cst_14 {dimension_numbers = #tpu.dot_dimension_numbers<[1], [0], [0], [1], [0, 0, 1, 1], [], []>} : vector<8x8xbf16>, vector<8x8xbf16>, vector<8x8xf32> -> vector<8x8xf32>
    %28 = arith.truncf %27 : vector<8x8xf32> to vector<8x8xbf16>
    %29 = vector.extract_strided_slice %3 {offsets = [0, 8], sizes = [8, 8], strides = [1, 1]} : vector<8x32xbf16> to vector<8x8xbf16>
    %30 = vector.extract_strided_slice %5 {offsets = [0, 8], sizes = [8, 8], strides = [1, 1]} : vector<8x32xbf16> to vector<8x8xbf16>
    %31 = vector.extract_strided_slice %7 {offsets = [0, 8], sizes = [8, 8], strides = [1, 1]} : vector<8x32xbf16> to vector<8x8xbf16>
    "tpu.trace_start"() <{level = 10 : i32, message = "qd,kd->qk"}> : () -> ()
    %cst_15 = arith.constant dense<0.000000e+00> : vector<8x8xf32>
    %32 = tpu.matmul %29, %30, %cst_15 {dimension_numbers = #tpu.dot_dimension_numbers<[1], [1], [0], [0], [0, 0, 1, 0], [], []>} : vector<8x8xbf16>, vector<8x8xbf16>, vector<8x8xf32> -> vector<8x8xf32>
    "tpu.trace_stop"() : () -> ()
    %cst_16 = arith.constant 0.353553385 : f32
    %33 = vector.broadcast %cst_16 : f32 to vector<8x8xf32>
    %34 = arith.mulf %32, %33 : vector<8x8xf32>
    %35 = vector.broadcast %1 : vector<1x8xf32> to vector<8x8xf32>
    %36 = arith.addf %34, %35 : vector<8x8xf32>
    %cst_17 = arith.constant dense<0xFF800000> : vector<8xf32>
    %37 = vector.multi_reduction <maximumf>, %36, %cst_17 [1] : vector<8x8xf32> to vector<8xf32>
    %38 = vector.shape_cast %37 : vector<8xf32> to vector<8x1xf32>
    %39 = vector.broadcast %38 : vector<8x1xf32> to vector<8x8xf32>
    %40 = arith.subf %36, %39 : vector<8x8xf32>
    %41 = math.exp %40 : vector<8x8xf32>
    %cst_18 = arith.constant dense<0.000000e+00> : vector<8xf32>
    %42 = vector.multi_reduction <add>, %41, %cst_18 [1] : vector<8x8xf32> to vector<8xf32>
    %43 = vector.shape_cast %42 : vector<8xf32> to vector<8x1xf32>
    %44 = tpu.reciprocal %43 {approx = true} : vector<8x1xf32> -> vector<8x1xf32>
    %45 = vector.broadcast %44 : vector<8x1xf32> to vector<8x8xf32>
    %46 = arith.mulf %41, %45 : vector<8x8xf32>
    %47 = arith.truncf %46 : vector<8x8xf32> to vector<8x8xbf16>
    %cst_19 = arith.constant dense<0.000000e+00> : vector<8x8xf32>
    %48 = tpu.matmul %47, %31, %cst_19 {dimension_numbers = #tpu.dot_dimension_numbers<[1], [0], [0], [1], [0, 0, 1, 1], [], []>} : vector<8x8xbf16>, vector<8x8xbf16>, vector<8x8xf32> -> vector<8x8xf32>
    %49 = arith.truncf %48 : vector<8x8xf32> to vector<8x8xbf16>
    %50 = vector.extract_strided_slice %3 {offsets = [0, 16], sizes = [8, 8], strides = [1, 1]} : vector<8x32xbf16> to vector<8x8xbf16>
    %51 = vector.extract_strided_slice %5 {offsets = [0, 16], sizes = [8, 8], strides = [1, 1]} : vector<8x32xbf16> to vector<8x8xbf16>
    %52 = vector.extract_strided_slice %7 {offsets = [0, 16], sizes = [8, 8], strides = [1, 1]} : vector<8x32xbf16> to vector<8x8xbf16>
    "tpu.trace_start"() <{level = 10 : i32, message = "qd,kd->qk"}> : () -> ()
    %cst_20 = arith.constant dense<0.000000e+00> : vector<8x8xf32>
    %53 = tpu.matmul %50, %51, %cst_20 {dimension_numbers = #tpu.dot_dimension_numbers<[1], [1], [0], [0], [0, 0, 1, 0], [], []>} : vector<8x8xbf16>, vector<8x8xbf16>, vector<8x8xf32> -> vector<8x8xf32>
    "tpu.trace_stop"() : () -> ()
    %cst_21 = arith.constant 0.353553385 : f32
    %54 = vector.broadcast %cst_21 : f32 to vector<8x8xf32>
    %55 = arith.mulf %53, %54 : vector<8x8xf32>
    %56 = vector.broadcast %1 : vector<1x8xf32> to vector<8x8xf32>
    %57 = arith.addf %55, %56 : vector<8x8xf32>
    %cst_22 = arith.constant dense<0xFF800000> : vector<8xf32>
    %58 = vector.multi_reduction <maximumf>, %57, %cst_22 [1] : vector<8x8xf32> to vector<8xf32>
    %59 = vector.shape_cast %58 : vector<8xf32> to vector<8x1xf32>
    %60 = vector.broadcast %59 : vector<8x1xf32> to vector<8x8xf32>
    %61 = arith.subf %57, %60 : vector<8x8xf32>
    %62 = math.exp %61 : vector<8x8xf32>
    %cst_23 = arith.constant dense<0.000000e+00> : vector<8xf32>
    %63 = vector.multi_reduction <add>, %62, %cst_23 [1] : vector<8x8xf32> to vector<8xf32>
    %64 = vector.shape_cast %63 : vector<8xf32> to vector<8x1xf32>
    %65 = tpu.reciprocal %64 {approx = true} : vector<8x1xf32> -> vector<8x1xf32>
    %66 = vector.broadcast %65 : vector<8x1xf32> to vector<8x8xf32>
    %67 = arith.mulf %62, %66 : vector<8x8xf32>
    %68 = arith.truncf %67 : vector<8x8xf32> to vector<8x8xbf16>
    %cst_24 = arith.constant dense<0.000000e+00> : vector<8x8xf32>
    %69 = tpu.matmul %68, %52, %cst_24 {dimension_numbers = #tpu.dot_dimension_numbers<[1], [0], [0], [1], [0, 0, 1, 1], [], []>} : vector<8x8xbf16>, vector<8x8xbf16>, vector<8x8xf32> -> vector<8x8xf32>
    %70 = arith.truncf %69 : vector<8x8xf32> to vector<8x8xbf16>
    %71 = vector.extract_strided_slice %3 {offsets = [0, 24], sizes = [8, 8], strides = [1, 1]} : vector<8x32xbf16> to vector<8x8xbf16>
    %72 = vector.extract_strided_slice %5 {offsets = [0, 24], sizes = [8, 8], strides = [1, 1]} : vector<8x32xbf16> to vector<8x8xbf16>
    %73 = vector.extract_strided_slice %7 {offsets = [0, 24], sizes = [8, 8], strides = [1, 1]} : vector<8x32xbf16> to vector<8x8xbf16>
    "tpu.trace_start"() <{level = 10 : i32, message = "qd,kd->qk"}> : () -> ()
    %cst_25 = arith.constant dense<0.000000e+00> : vector<8x8xf32>
    %74 = tpu.matmul %71, %72, %cst_25 {dimension_numbers = #tpu.dot_dimension_numbers<[1], [1], [0], [0], [0, 0, 1, 0], [], []>} : vector<8x8xbf16>, vector<8x8xbf16>, vector<8x8xf32> -> vector<8x8xf32>
    "tpu.trace_stop"() : () -> ()
    %cst_26 = arith.constant 0.353553385 : f32
    %75 = vector.broadcast %cst_26 : f32 to vector<8x8xf32>
    %76 = arith.mulf %74, %75 : vector<8x8xf32>
    %77 = vector.broadcast %1 : vector<1x8xf32> to vector<8x8xf32>
    %78 = arith.addf %76, %77 : vector<8x8xf32>
    %cst_27 = arith.constant dense<0xFF800000> : vector<8xf32>
    %79 = vector.multi_reduction <maximumf>, %78, %cst_27 [1] : vector<8x8xf32> to vector<8xf32>
    %80 = vector.shape_cast %79 : vector<8xf32> to vector<8x1xf32>
    %81 = vector.broadcast %80 : vector<8x1xf32> to vector<8x8xf32>
    %82 = arith.subf %78, %81 : vector<8x8xf32>
    %83 = math.exp %82 : vector<8x8xf32>
    %cst_28 = arith.constant dense<0.000000e+00> : vector<8xf32>
    %84 = vector.multi_reduction <add>, %83, %cst_28 [1] : vector<8x8xf32> to vector<8xf32>
    %85 = vector.shape_cast %84 : vector<8xf32> to vector<8x1xf32>
    %86 = tpu.reciprocal %85 {approx = true} : vector<8x1xf32> -> vector<8x1xf32>
    %87 = vector.broadcast %86 : vector<8x1xf32> to vector<8x8xf32>
    %88 = arith.mulf %83, %87 : vector<8x8xf32>
    %89 = arith.truncf %88 : vector<8x8xf32> to vector<8x8xbf16>
    %cst_29 = arith.constant dense<0.000000e+00> : vector<8x8xf32>
    %90 = tpu.matmul %89, %73, %cst_29 {dimension_numbers = #tpu.dot_dimension_numbers<[1], [0], [0], [1], [0, 0, 1, 1], [], []>} : vector<8x8xbf16>, vector<8x8xbf16>, vector<8x8xf32> -> vector<8x8xf32>
    %91 = arith.truncf %90 : vector<8x8xf32> to vector<8x8xbf16>
    %92 = tpu.concatenate %28, %49, %70, %91 in 1 : vector<8x8xbf16>, vector<8x8xbf16>, vector<8x8xbf16>, vector<8x8xbf16> -> vector<8x32xbf16>
    %c0_30 = arith.constant 0 : index
    %c0_31 = arith.constant 0 : index
    %c0_32 = arith.constant 0 : index
    %93 = vector.load %arg5[%c0_30, %c0_31, %c0_32] : memref<1x8x32xbf16, #tpu.memory_space<vmem>>, vector<1x8x32xbf16>
    %94 = vector.shape_cast %93 : vector<1x8x32xbf16> to vector<8x32xbf16>
    %95 = vector.shape_cast %92 : vector<8x32xbf16> to vector<1x8x32xbf16>
    tpu.vector_store %arg5[%c0_30, %c0_31, %c0_32], %95 {strides = array<i32>} : memref<1x8x32xbf16, #tpu.memory_space<vmem>>, vector<1x8x32xbf16>,
    return
  }
  func.func @transform_0(%arg0: i32) -> (i32, i32, i32) {
    %c0_i32 = arith.constant 0 : i32
    %c0_i32_0 = arith.constant 0 : i32
    %c0_i32_1 = arith.constant 0 : i32
    return %arg0, %c0_i32, %c0_i32_0 : i32, i32, i32
  }
  func.func @transform_1(%arg0: i32) -> (i32, i32, i32) {
    %c0_i32 = arith.constant 0 : i32
    %c0_i32_0 = arith.constant 0 : i32
    %c0_i32_1 = arith.constant 0 : i32
    return %arg0, %c0_i32, %c0_i32_0 : i32, i32, i32
  }
  func.func @transform_2(%arg0: i32) -> (i32, i32, i32) {
    %c0_i32 = arith.constant 0 : i32
    %c0_i32_0 = arith.constant 0 : i32
    %c0_i32_1 = arith.constant 0 : i32
    return %arg0, %c0_i32, %c0_i32_0 : i32, i32, i32
  }
  func.func @transform_3(%arg0: i32) -> (i32, i32, i32) {
    %c0_i32 = arith.constant 0 : i32
    %c0_i32_0 = arith.constant 0 : i32
    %c0_i32_1 = arith.constant 0 : i32
    return %arg0, %c0_i32, %c0_i32_0 : i32, i32, i32
  }
  func.func @transform_4(%arg0: i32) -> (i32, i32, i32) {
    %c0_i32 = arith.constant 0 : i32
    %c0_i32_0 = arith.constant 0 : i32
    %c0_i32_1 = arith.constant 0 : i32
    return %arg0, %c0_i32, %c0_i32_0 : i32, i32, i32
  }
}

module attributes {stable_mosaic.version = 11 : i64} {
  func.func @_ffn_kernel(%arg0: i32, %arg1: i32, %arg2: memref<16x32xbf16, #tpu.memory_space<vmem>>, %arg3: memref<32x128xbf16, #tpu.memory_space<vmem>>, %arg4: memref<1x128xf32, #tpu.memory_space<vmem>>, %arg5: memref<128x32xbf16, #tpu.memory_space<vmem>>, %arg6: memref<1x32xf32, #tpu.memory_space<vmem>>, %arg7: memref<1x32xf32, #tpu.memory_space<vmem>>, %arg8: memref<1x32xf32, #tpu.memory_space<vmem>>, %arg9: memref<16x32xbf16, #tpu.memory_space<vmem>>, %arg10: memref<16x32xf32, #tpu.memory_space<vmem>>) attributes {dimension_semantics = [#tpu.dimension_semantics<parallel>, #tpu.dimension_semantics<arbitrary>], iteration_bounds = array<i64: 1, 1>, scalar_prefetch = 0 : i64, scratch_operands = 1 : i64, tpu.core_type = #tpu.core_type<tc>, window_params = [{transform_indices = @transform_0, window_bounds = array<i64: 16, 32>}, {transform_indices = @transform_1, window_bounds = array<i64: 32, 128>}, {transform_indices = @transform_2, window_bounds = array<i64: 1, 128>}, {transform_indices = @transform_3, window_bounds = array<i64: 128, 32>}, {pipeline_mode = #tpu.pipeline_mode<synchronous>, transform_indices = @transform_4, window_bounds = array<i64: 1, 32>}, {pipeline_mode = #tpu.pipeline_mode<synchronous>, transform_indices = @transform_5, window_bounds = array<i64: 1, 32>}, {pipeline_mode = #tpu.pipeline_mode<synchronous>, transform_indices = @transform_6, window_bounds = array<i64: 1, 32>}, {transform_indices = @transform_7, window_bounds = array<i64: 16, 32>}]} {
    %c0_i32 = arith.constant 0 : i32
    %0 = arith.cmpi eq, %arg1, %c0_i32 : i32
    %1 = arith.extui %0 : i1 to i32
    %c0_i32_0 = arith.constant 0 : i32
    %2 = arith.cmpi ne, %1, %c0_i32_0 : i32
    scf.if %2 {
      %cst_18 = arith.constant 0.000000e+00 : f32
      %26 = vector.broadcast %cst_18 : f32 to vector<16x32xf32>
      %c0_19 = arith.constant 0 : index
      %c0_20 = arith.constant 0 : index
      %27 = vector.load %arg10[%c0_19, %c0_20] : memref<16x32xf32, #tpu.memory_space<vmem>>, vector<16x32xf32>
      tpu.vector_store %arg10[%c0_19, %c0_20], %26 {strides = array<i32>} : memref<16x32xf32, #tpu.memory_space<vmem>>, vector<16x32xf32>,
    } else {
    }
    %c0 = arith.constant 0 : index
    %c0_1 = arith.constant 0 : index
    %3 = vector.load %arg2[%c0, %c0_1] : memref<16x32xbf16, #tpu.memory_space<vmem>>, vector<16x32xbf16>
    %c0_2 = arith.constant 0 : index
    %c0_3 = arith.constant 0 : index
    %4 = vector.load %arg3[%c0_2, %c0_3] : memref<32x128xbf16, #tpu.memory_space<vmem>>, vector<32x128xbf16>
    %cst = arith.constant dense<0.000000e+00> : vector<16x128xf32>
    %5 = tpu.matmul %3, %4, %cst {dimension_numbers = #tpu.dot_dimension_numbers<[1], [0], [0], [1], [0, 0, 1, 1], [], []>} : vector<16x32xbf16>, vector<32x128xbf16>, vector<16x128xf32> -> vector<16x128xf32>
    %c0_4 = arith.constant 0 : index
    %c0_5 = arith.constant 0 : index
    %6 = vector.load %arg4[%c0_4, %c0_5] : memref<1x128xf32, #tpu.memory_space<vmem>>, vector<1x128xf32>
    %7 = vector.broadcast %6 : vector<1x128xf32> to vector<16x128xf32>
    %8 = arith.addf %5, %7 : vector<16x128xf32>
    %cst_6 = arith.constant 5.000000e-01 : f32
    %9 = vector.broadcast %cst_6 : f32 to vector<16x128xf32>
    %10 = arith.mulf %9, %8 : vector<16x128xf32>
    %cst_7 = arith.constant 0.707106769 : f32
    %11 = vector.broadcast %cst_7 : f32 to vector<16x128xf32>
    %12 = arith.mulf %8, %11 : vector<16x128xf32>
    %13 = math.erf %12 : vector<16x128xf32>
    %cst_8 = arith.constant 1.000000e+00 : f32
    %14 = vector.broadcast %cst_8 : f32 to vector<16x128xf32>
    %15 = arith.addf %14, %13 : vector<16x128xf32>
    %16 = arith.mulf %10, %15 : vector<16x128xf32>
    %c0_9 = arith.constant 0 : index
    %c0_10 = arith.constant 0 : index
    %17 = vector.load %arg10[%c0_9, %c0_10] : memref<16x32xf32, #tpu.memory_space<vmem>>, vector<16x32xf32>
    %18 = arith.truncf %16 : vector<16x128xf32> to vector<16x128xbf16>
    %c0_11 = arith.constant 0 : index
    %c0_12 = arith.constant 0 : index
    %19 = vector.load %arg5[%c0_11, %c0_12] : memref<128x32xbf16, #tpu.memory_space<vmem>>, vector<128x32xbf16>
    %cst_13 = arith.constant dense<0.000000e+00> : vector<16x32xf32>
    %20 = tpu.matmul %18, %19, %cst_13 {dimension_numbers = #tpu.dot_dimension_numbers<[1], [0], [0], [1], [0, 0, 1, 1], [], []>} : vector<16x128xbf16>, vector<128x32xbf16>, vector<16x32xf32> -> vector<16x32xf32>
    %21 = arith.addf %17, %20 : vector<16x32xf32>
    %c0_14 = arith.constant 0 : index
    %c0_15 = arith.constant 0 : index
    %22 = vector.load %arg10[%c0_14, %c0_15] : memref<16x32xf32, #tpu.memory_space<vmem>>, vector<16x32xf32>
    tpu.vector_store %arg10[%c0_14, %c0_15], %21 {strides = array<i32>} : memref<16x32xf32, #tpu.memory_space<vmem>>, vector<16x32xf32>,
    %c0_i32_16 = arith.constant 0 : i32
    %23 = arith.cmpi eq, %arg1, %c0_i32_16 : i32
    %24 = arith.extui %23 : i1 to i32
    %c0_i32_17 = arith.constant 0 : i32
    %25 = arith.cmpi ne, %24, %c0_i32_17 : i32
    scf.if %25 {
      %c0_18 = arith.constant 0 : index
      %c0_19 = arith.constant 0 : index
      %26 = vector.load %arg10[%c0_18, %c0_19] : memref<16x32xf32, #tpu.memory_space<vmem>>, vector<16x32xf32>
      %c0_20 = arith.constant 0 : index
      %c0_21 = arith.constant 0 : index
      %27 = vector.load %arg6[%c0_20, %c0_21] : memref<1x32xf32, #tpu.memory_space<vmem>>, vector<1x32xf32>
      %28 = vector.broadcast %27 : vector<1x32xf32> to vector<16x32xf32>
      %29 = arith.addf %26, %28 : vector<16x32xf32>
      %c0_22 = arith.constant 0 : index
      %c0_23 = arith.constant 0 : index
      %30 = vector.load %arg2[%c0_22, %c0_23] : memref<16x32xbf16, #tpu.memory_space<vmem>>, vector<16x32xbf16>
      %31 = arith.extf %30 : vector<16x32xbf16> to vector<16x32xf32>
      %32 = arith.addf %29, %31 : vector<16x32xf32>
      %cst_24 = arith.constant dense<0.000000e+00> : vector<16xf32>
      %33 = vector.multi_reduction <add>, %32, %cst_24 [1] : vector<16x32xf32> to vector<16xf32>
      %34 = vector.shape_cast %33 : vector<16xf32> to vector<16x1xf32>
      %cst_25 = arith.constant 3.200000e+01 : f32
      %35 = vector.broadcast %cst_25 : f32 to vector<16x1xf32>
      %36 = arith.divf %34, %35 : vector<16x1xf32>
      %37 = vector.broadcast %36 : vector<16x1xf32> to vector<16x32xf32>
      %38 = arith.subf %32, %37 : vector<16x32xf32>
      %39 = vector.broadcast %36 : vector<16x1xf32> to vector<16x32xf32>
      %40 = arith.subf %32, %39 : vector<16x32xf32>
      %41 = arith.mulf %38, %40 : vector<16x32xf32>
      %cst_26 = arith.constant dense<0.000000e+00> : vector<16xf32>
      %42 = vector.multi_reduction <add>, %41, %cst_26 [1] : vector<16x32xf32> to vector<16xf32>
      %43 = vector.shape_cast %42 : vector<16xf32> to vector<16x1xf32>
      %cst_27 = arith.constant 3.200000e+01 : f32
      %44 = vector.broadcast %cst_27 : f32 to vector<16x1xf32>
      %45 = arith.divf %43, %44 : vector<16x1xf32>
      %46 = vector.broadcast %36 : vector<16x1xf32> to vector<16x32xf32>
      %47 = arith.subf %32, %46 : vector<16x32xf32>
      %cst_28 = arith.constant 9.99999996E-13 : f32
      %48 = vector.broadcast %cst_28 : f32 to vector<16x1xf32>
      %49 = arith.addf %45, %48 : vector<16x1xf32>
      %50 = math.rsqrt %49 : vector<16x1xf32>
      %51 = vector.broadcast %50 : vector<16x1xf32> to vector<16x32xf32>
      %52 = arith.mulf %47, %51 : vector<16x32xf32>
      %c0_29 = arith.constant 0 : index
      %c0_30 = arith.constant 0 : index
      %53 = vector.load %arg7[%c0_29, %c0_30] : memref<1x32xf32, #tpu.memory_space<vmem>>, vector<1x32xf32>
      %54 = vector.broadcast %53 : vector<1x32xf32> to vector<16x32xf32>
      %55 = arith.mulf %52, %54 : vector<16x32xf32>
      %c0_31 = arith.constant 0 : index
      %c0_32 = arith.constant 0 : index
      %56 = vector.load %arg8[%c0_31, %c0_32] : memref<1x32xf32, #tpu.memory_space<vmem>>, vector<1x32xf32>
      %57 = vector.broadcast %56 : vector<1x32xf32> to vector<16x32xf32>
      %58 = arith.addf %55, %57 : vector<16x32xf32>
      %59 = arith.truncf %58 : vector<16x32xf32> to vector<16x32xbf16>
      %c0_33 = arith.constant 0 : index
      %c0_34 = arith.constant 0 : index
      %60 = vector.load %arg9[%c0_33, %c0_34] : memref<16x32xbf16, #tpu.memory_space<vmem>>, vector<16x32xbf16>
      tpu.vector_store %arg9[%c0_33, %c0_34], %59 {strides = array<i32>} : memref<16x32xbf16, #tpu.memory_space<vmem>>, vector<16x32xbf16>,
    } else {
    }
    return
  }
  func.func @transform_0(%arg0: i32, %arg1: i32) -> (i32, i32) {
    %c0_i32 = arith.constant 0 : i32
    %c0_i32_0 = arith.constant 0 : i32
    return %arg0, %c0_i32 : i32, i32
  }
  func.func @transform_1(%arg0: i32, %arg1: i32) -> (i32, i32) {
    %c0_i32 = arith.constant 0 : i32
    %c0_i32_0 = arith.constant 0 : i32
    return %c0_i32, %arg1 : i32, i32
  }
  func.func @transform_2(%arg0: i32, %arg1: i32) -> (i32, i32) {
    %c0_i32 = arith.constant 0 : i32
    %c0_i32_0 = arith.constant 0 : i32
    return %c0_i32, %arg1 : i32, i32
  }
  func.func @transform_3(%arg0: i32, %arg1: i32) -> (i32, i32) {
    %c0_i32 = arith.constant 0 : i32
    %c0_i32_0 = arith.constant 0 : i32
    return %arg1, %c0_i32 : i32, i32
  }
  func.func @transform_4(%arg0: i32, %arg1: i32) -> (i32, i32) {
    %c0_i32 = arith.constant 0 : i32
    %c0_i32_0 = arith.constant 0 : i32
    %c0_i32_1 = arith.constant 0 : i32
    return %c0_i32, %c0_i32_0 : i32, i32
  }
  func.func @transform_5(%arg0: i32, %arg1: i32) -> (i32, i32) {
    %c0_i32 = arith.constant 0 : i32
    %c0_i32_0 = arith.constant 0 : i32
    %c0_i32_1 = arith.constant 0 : i32
    return %c0_i32, %c0_i32_0 : i32, i32
  }
  func.func @transform_6(%arg0: i32, %arg1: i32) -> (i32, i32) {
    %c0_i32 = arith.constant 0 : i32
    %c0_i32_0 = arith.constant 0 : i32
    %c0_i32_1 = arith.constant 0 : i32
    return %c0_i32, %c0_i32_0 : i32, i32
  }
  func.func @transform_7(%arg0: i32, %arg1: i32) -> (i32, i32) {
    %c0_i32 = arith.constant 0 : i32
    %c0_i32_0 = arith.constant 0 : i32
    return %arg0, %c0_i32 : i32, i32
  }
}

</mosaic_0001>

<bundles_post_ra>
// kernel: bert_classifier_forward.9
= control target key start
LH: loop header
LB: loop body
LE: loop exit
PB: predicated region body
PF: predicated region fallthrough
CT: control target
= control target key end

     0   :  { %vm27_vm0 = vcmask 261120   ;;  %vm81_vm1 = vcmask 257024   ;;  %s153_s0 = inlined_call_operand.vmem [shape: bf16[16,32], index: 0, kind: input, shape index: {}]   ;;  %s154_s1 = inlined_call_operand.vmem [shape: bf16[16,32], index: 1, kind: input, shape index: {}]   ;;  %s155_s2 = inlined_call_operand.vmem [shape: f32[1,32], index: 2, kind: input, shape index: {}]   ;;  %s156_s3 = inlined_call_operand.vmem [shape: f32[1,32], index: 3, kind: input, shape index: {}]   ;;  %s157_s4 = inlined_call_operand.vmem [shape: bf16[16,32], index: 4, kind: output, shape index: {}]  }
   0x1   :  { %v95_v0 = vld [vmem:[%s153_s0] sm:$0xff]  }
   0x2   :  { %v99_v1 = vld [vmem:[%s154_s1] sm:$0xff]   ;;  %v96_v2 = vunpack.c.l.bf16 %v95_v0  ;;  %v97_v4 = vunpack.c.h.bf16 %v95_v0 }
   0x3   :  { %v100_v3 = vunpack.c.l.bf16 %v99_v1  ;;  %v101_v5 = vunpack.c.h.bf16 %v99_v1  ;;  %v88_v27 = vld [vmem:[%s155_s2] ss:$0 sm:$0xff] }
   0x4   :  { %v89_v29 = vld [vmem:[%s156_s3] ss:$0 sm:$0xff] }
   0x5   :  { %v25_v6 = vadd.f32 %v100_v3, %v96_v2  ;;  %v26_v7 = vadd.f32 %v101_v5, %v97_v4 }
   0x7   :  { %v28_v8 = vsel %vm27_vm0, %v25_v6, 0.0  ;;  %v31_v9 = vsel %vm27_vm0, %v26_v7, 0.0 }
   0x8   :  { %29 = vadd.xlane.f32.xlu0 %v28_v8 }
   0xc   :  { %32 = vadd.xlane.f32.xlu0 %v31_v9 }
  0x95   :  { %v30_v10 = vpop.xlane.xlu0 %29 }
  0x96   :  { %v35_v11 = vmul.f32 0.03125, %v30_v10 }
  0x98   :  { %v37_v12 = vsub.f32 %v25_v6, %v35_v11 }
  0x99   :  { %v33_v13 = vpop.xlane.xlu0 %32 }
  0x9a   :  { %v36_v14 = vmul.f32 0.03125, %v33_v13  ;;  %v39_v15 = vmul.f32 %v37_v12, %v37_v12 }
  0x9c   :  { %v38_v16 = vsub.f32 %v26_v7, %v36_v14  ;;  %v41_v17 = vsel %vm27_vm0, %v39_v15, 0.0 }
  0x9d   :  { %42 = vadd.xlane.f32.xlu1 %v41_v17 }
  0x9e   :  { %v40_v18 = vmul.f32 %v38_v16, %v38_v16 }
  0xa0   :  { %v44_v19 = vsel %vm27_vm0, %v40_v18, 0.0 }
  0xa1   :  { %45 = vadd.xlane.f32.xlu1 %v44_v19 }
 0x12a   :  { %v43_v20 = vpop.xlane.xlu1 %42 }
 0x12b   :  { %v47_v21 = vmul.f32 0.03125, %v43_v20 }
 0x12d   :  { %v49_v22 = vadd.f32 1e-12, %v47_v21 }
 0x12e   :  { %v46_v23 = vpop.xlane.xlu1 %45 }
 0x12f   :  { %102 = vrsqrt.f32 %v49_v22  ;;  %v48_v24 = vmul.f32 0.03125, %v46_v23 }
 0x131   :  { %v50_v25 = vadd.f32 1e-12, %v48_v24 }
 0x133   :  { %104 = vrsqrt.f32 %v50_v25 }
 0x139   :  { %v103_v26 = vpop.eup %102 }
 0x13a   :  { %v53_v28 = vmul.f32 %v103_v26, %v37_v12 }
 0x13c   :  { %v62_v30 = vmul.f32 %v88_v27, %v53_v28 }
 0x13d   :  { %v105_v31 = vpop.eup %104 }
 0x13e   :  { %v71_v32 = vadd.f32 %v89_v29, %v62_v30  ;;  %v54_v33 = vmul.f32 %v105_v31, %v38_v16 }
 0x140   :  { %v92_v34 = vpack.c.bf16 %v71_v32, %v71_v32  ;;  %v63_v35 = vmul.f32 %v88_v27, %v54_v33 }
 0x142   :  { %82 = vst.msk [vmem:[%s157_s4] sm:$0xf] %vm81_vm1, %v92_v34  ;;  %v72_v36 = vadd.f32 %v89_v29, %v63_v35 }
 0x144   :  { %v93_v37 = vpack.c.bf16 %v72_v36, %v72_v36 }
 0x146   :  { %83 = vst.msk [vmem:[%s157_s4 + $0x4] sm:$0xf] %vm81_vm1, %v93_v37 }

// kernel: bert_classifier_forward.12
= control target key start
LH: loop header
LB: loop body
LE: loop exit
PB: predicated region body
PF: predicated region fallthrough
CT: control target
= control target key end

     0   :  { %v200_v0 = vmov 0.0   ;;  %vm201_vm0 = vmmov 0   ;;  %vm54_vm1 = vcmask 261120   ;;  %vm158_vm2 = vcmask 257024   ;;  %s269_s1 = inlined_call_operand.vmem [shape: bf16[32,32], index: 1, kind: input, shape index: {}]   ;;  %s270_s0 = inlined_call_operand.vmem [shape: bf16[16,32], index: 0, kind: input, shape index: {}]   ;;  %s271_s3 = inlined_call_operand.vmem [shape: bf16[16,32], index: 3, kind: input, shape index: {}]   ;;  %s272_s2 = inlined_call_operand.vmem [shape: f32[1,32], index: 2, kind: input, shape index: {}]   ;;  %s273_s4 = inlined_call_operand.vmem [shape: f32[1,32], index: 4, kind: input, shape index: {}]   ;;  %s274_s5 = inlined_call_operand.vmem [shape: f32[1,32], index: 5, kind: input, shape index: {}]   ;;  %s275_s6 = inlined_call_operand.vmem [shape: bf16[16,32], index: 6, kind: output, shape index: {}]  }
   0x1   :  { %183 = vmatprep.subr.bf16.mxu0 %v200_v0  ;;  %v193_v1 = vld [vmem:[%s269_s1] sm:$0xff]   ;;  %187 = vmatprep.mubr.msk.bf16.mxu0 %vm201_vm0, %v200_v0  ;;  %v194_v2 = vld [vmem:[%s269_s1 + $0x8] sm:$0xff]  }
   0x2   :  { %184 = vmatpush3.bf16.msra.mxu0 %v193_v1  ;;  %v195_v3 = vld [vmem:[%s270_s0] sm:$0xff]  }
   0x3   :  { %185 = vmatprep.subr.bf16.mxu0 %v200_v0  ;;  %v177_v4 = vld [vmem:[%s271_s3] sm:$0xff]  }
   0x4   :  { %v165_v5 = vld [vmem:[%s272_s2] ss:$0 sm:$0xff]  ;;  %v178_v6 = vunpack.c.l.bf16 %v177_v4  ;;  %v179_v10 = vunpack.c.h.bf16 %v177_v4 }
   0x5   :  { %v170_v35 = vld [vmem:[%s273_s4] ss:$0 sm:$0xff] }
   0x6   :  { %186 = vmatpush3.bf16.msra.mxu0 %v194_v2  ;;  %v171_v37 = vld [vmem:[%s274_s5] ss:$0 sm:$0xff] }
   0x9   :  { %188 = vmatmul.mubr.msk.bf16.vlgmr.msra.gmra.mrb[0].mxu0 %vm54_vm1, %v195_v3 }
  0xdc   :  { %v92_v7 = vpop.f32.mrb[0].mxu0 }
  0xdd   :  { %v93_v8 = vadd.f32 %v165_v5, %v92_v7  ;;  %v189_v9 = vpop.f32.mrb[1].mxu0 }
  0xde   :  { %v95_v11 = vpop.f32.mrb[2].mxu0 }
  0xdf   :  { %v96_v12 = vadd.f32 %v165_v5, %v95_v11  ;;  %v190_v13 = vpop.f32.mrb[3].mxu0  ;;  %v103_v14 = vadd.f32 %v178_v6, %v93_v8 }
  0xe1   :  { %v105_v15 = vsel %vm54_vm1, %v103_v14, 0.0  ;;  %v104_v16 = vadd.f32 %v179_v10, %v96_v12 }
  0xe2   :  { %106 = vadd.xlane.f32.xlu0 %v105_v15 }
  0xe3   :  { %v108_v17 = vsel %vm54_vm1, %v104_v16, 0.0 }
  0xe6   :  { %109 = vadd.xlane.f32.xlu0 %v108_v17 }
 0x16f   :  { %v107_v18 = vpop.xlane.xlu0 %106 }
 0x170   :  { %v112_v19 = vmul.f32 0.03125, %v107_v18 }
 0x172   :  { %v114_v20 = vsub.f32 %v103_v14, %v112_v19 }
 0x173   :  { %v110_v21 = vpop.xlane.xlu0 %109 }
 0x174   :  { %v113_v22 = vmul.f32 0.03125, %v110_v21  ;;  %v116_v23 = vmul.f32 %v114_v20, %v114_v20 }
 0x176   :  { %v115_v24 = vsub.f32 %v104_v16, %v113_v22  ;;  %v118_v25 = vsel %vm54_vm1, %v116_v23, 0.0 }
 0x177   :  { %119 = vadd.xlane.f32.xlu1 %v118_v25 }
 0x178   :  { %v117_v26 = vmul.f32 %v115_v24, %v115_v24 }
 0x17a   :  { %v121_v27 = vsel %vm54_vm1, %v117_v26, 0.0 }
 0x17b   :  { %122 = vadd.xlane.f32.xlu1 %v121_v27 }
 0x204   :  { %v120_v28 = vpop.xlane.xlu1 %119 }
 0x205   :  { %v124_v29 = vmul.f32 0.03125, %v120_v28 }
 0x207   :  { %v126_v30 = vadd.f32 1e-12, %v124_v29 }
 0x208   :  { %v123_v31 = vpop.xlane.xlu1 %122 }
 0x209   :  { %196 = vrsqrt.f32 %v126_v30  ;;  %v125_v32 = vmul.f32 0.03125, %v123_v31 }
 0x20b   :  { %v127_v33 = vadd.f32 1e-12, %v125_v32 }
 0x20d   :  { %198 = vrsqrt.f32 %v127_v33 }
 0x213   :  { %v197_v34 = vpop.eup %196 }
 0x214   :  { %v130_v36 = vmul.f32 %v197_v34, %v114_v20 }
 0x216   :  { %v139_v38 = vmul.f32 %v170_v35, %v130_v36 }
 0x217   :  { %v199_v39 = vpop.eup %198 }
 0x218   :  { %v148_v40 = vadd.f32 %v171_v37, %v139_v38  ;;  %v131_v41 = vmul.f32 %v199_v39, %v115_v24 }
 0x21a   :  { %v174_v42 = vpack.c.bf16 %v148_v40, %v148_v40  ;;  %v140_v43 = vmul.f32 %v170_v35, %v131_v41 }
 0x21c   :  { %159 = vst.msk [vmem:[%s275_s6] sm:$0xf] %vm158_vm2, %v174_v42  ;;  %v149_v44 = vadd.f32 %v171_v37, %v140_v43 }
 0x21e   :  { %v175_v45 = vpack.c.bf16 %v149_v44, %v149_v44 }
 0x220   :  { %160 = vst.msk [vmem:[%s275_s6 + $0x4] sm:$0xf] %vm158_vm2, %v175_v45 }

// kernel: bert_classifier_forward.10
= control target key start
LH: loop header
LB: loop body
LE: loop exit
PB: predicated region body
PF: predicated region fallthrough
CT: control target
= control target key end

     0   :  { %v159_v0 = vmov 0.0   ;;  %vm160_vm0 = vmmov 0   ;;  %vm48_vm1 = vcmask 261120   ;;  %vm101_vm2 = vcmask 257024   ;;  %s162_s27 = smov 96   ;;  %s229_s1 = inlined_call_operand.vmem [shape: bf16[32,96], index: 1, kind: input, shape index: {}]   ;;  %s230_s0 = inlined_call_operand.vmem [shape: bf16[16,32], index: 0, kind: input, shape index: {}]   ;;  %s231_s2 = inlined_call_operand.vmem [shape: f32[1,96], index: 2, kind: input, shape index: {}]   ;;  %s232_s3 = inlined_call_operand.vmem [shape: bf16[16,32], index: 3, kind: output, shape index: {0}]   ;;  %s233_s5 = inlined_call_operand.vmem [shape: bf16[16,32], index: 5, kind: output, shape index: {2}]   ;;  %s234_s4 = inlined_call_operand.vmem [shape: bf16[16,32], index: 4, kind: output, shape index: {1}]  }
   0x1   :  { %144 = vmatprep.subr.bf16.mxu0 %v159_v0  ;;  %v156_v1 = vld [vmem:[%s229_s1] sm:$0xff]   ;;  %148 = vmatprep.mubr.msk.bf16.mxu0 %vm160_vm0, %v159_v0  ;;  %v157_v2 = vld [vmem:[%s229_s1 + $0x8] sm:$0xff]  }
   0x2   :  { %145 = vmatpush3.bf16.msra.mxu0 %v156_v1  ;;  %v158_v3 = vld [vmem:[%s230_s0] sm:$0xff]   ;;  %s161_s0 = smov 64  }
   0x3   :  { %146 = vmatprep.subr.bf16.mxu0 %v159_v0  ;;  %v132_v4 = vld [vmem:[%s231_s2] ss:$0 sm:$0xff] }
   0x6   :  { %147 = vmatpush3.bf16.msra.mxu0 %v157_v2 }
   0x9   :  { %149 = vmatmul.mubr.msk.bf16.vlgmr.msra.gmra.mrb[0].mxu0 %vm48_vm1, %v158_v3 }
  0xdc   :  { %v86_v5 = vpop.f32.mrb[0].mxu0 }
  0xdd   :  { %v87_v6 = vadd.f32 %v132_v4, %v86_v5  ;;  %v150_v7 = vpop.f32.mrb[1].mxu0 }
  0xde   :  { %v89_v8 = vpop.f32.mrb[2].mxu0 }
  0xdf   :  { %v139_v9 = vpack.c.bf16 %v87_v6, %v87_v6  ;;  %v90_v10 = vadd.f32 %v132_v4, %v89_v8  ;;  %v151_v11 = vpop.f32.mrb[3].mxu0 }
  0xe1   :  { %102 = vst.msk [vmem:[%s232_s3] sm:$0xf] %vm101_vm2, %v139_v9  ;;  %v140_v12 = vpack.c.bf16 %v90_v10, %v90_v10  ;;  %112 = vrot.lane.b32.xlu1 %v139_v9, %s161_s0  ;;  %104 = vrot.lane.b32.xlu0 %v139_v9, %s162_s27 }
  0xe3   :  { %103 = vst.msk [vmem:[%s232_s3 + $0x4] sm:$0xf] %vm101_vm2, %v140_v12 }
  0xe5   :  { %114 = vrot.lane.b32.xlu1 %v140_v12, %s161_s0  ;;  %106 = vrot.lane.b32.xlu0 %v140_v12, %s162_s27 }
 0x153   :  { %v113_v13 = vpop.permute.xlu1 %112  ;;  %v105_v14 = vpop.permute.xlu0 %104 }
 0x154   :  { %118 = vst.msk [vmem:[%s233_s5] sm:$0xf] %vm101_vm2, %v113_v13  ;;  %110 = vst.msk [vmem:[%s234_s4] sm:$0xf] %vm101_vm2, %v105_v14 }
 0x157   :  { %v115_v15 = vpop.permute.xlu1 %114  ;;  %v107_v16 = vpop.permute.xlu0 %106 }
 0x158   :  { %119 = vst.msk [vmem:[%s233_s5 + $0x4] sm:$0xf] %vm101_vm2, %v115_v15  ;;  %111 = vst.msk [vmem:[%s234_s4 + $0x4] sm:$0xf] %vm101_vm2, %v107_v16 }

// kernel: bert_classifier_forward.11
= control target key start
LH: loop header
LB: loop body
LE: loop exit
PB: predicated region body
PF: predicated region fallthrough
CT: control target
= control target key end

     0   :  { %s979_s15 = smov 0   ;;  %s1084_s0 = inlined_call_operand.vmem [shape: bf16[2,8,32], index: 0, kind: input, shape index: {}]   ;;  %s1085_s1 = inlined_call_operand.vmem [shape: bf16[2,8,32], index: 1, kind: input, shape index: {}]   ;;  %s1086_s2 = inlined_call_operand.vmem [shape: bf16[2,8,32], index: 2, kind: input, shape index: {}]   ;;  %s1087_s3 = inlined_call_operand.vmem [shape: f32[2,1,8], index: 3, kind: input, shape index: {}]   ;;  %s1088_s4 = inlined_call_operand.vmem [shape: bf16[2,8,32], index: 4, kind: output, shape index: {}]  }
   0x1 LB: > { %s816_s16 = sadd.s32 4294967295, %s944_s15   ;;  %p820_p0 = scmp.ge.s32.totalorder %s944_s15, 1  ;;  %s944_s15 = sphi %s979_s15, %s14_s15  }
   0x2   : > { %p187_p1 = scmp.lt.s32.totalorder %s944_s15, 3 }
   0x4   : > { %p188_p2 = pnand %p820_p0, %p187_p1 }
   0x5   : > { %p222_p3 = scmp.lt.s32.totalorder (!%p188_p2), %s816_s16, 1  ;;  %v946_v0 = vmov (!%p188_p2), 0.0   ;;  %vm947_vm0 = vmmov (!%p188_p2), 0   ;;  %vm246_vm1 = vcmask (!%p188_p2), 64512   ;;  %s948_s27 = smov (!%p188_p2), 120   ;;  %vm316_vm2 = vcmask (!%p188_p2), 1043456  }
   0x6   : > { %191 = sbr.rel (%p188_p2) target bundleno = 1481 (0x5c9), region = 36  ;;  %855 = vmatprep.subr.bf16.mxu0 (!%p188_p2), %v946_v0  ;;  %857 = vmatprep.mubr.msk.bf16.mxu0 (!%p188_p2), %vm947_vm0, %v946_v0  ;;  %s949_s28 = smov (!%p188_p2), 112   ;;  %vm721_vm3 = vcmask (!%p188_p2), 130048   ;;  %vm724_vm4 = vcmask (!%p188_p2), 195584   ;;  %vm728_vm5 = vcmask (!%p188_p2), 257024  }
   0x7   : > { %861 = vmatprep.subr.bf16.mxu1 (!%p188_p2), %v946_v0  ;;  %863 = vmatprep.mubr.msk.bf16.mxu1 (!%p188_p2), %vm947_vm0, %v946_v0  ;;  %s950_s29 = smov (!%p188_p2), 104   ;;  %s951_s7 = smov (!%p188_p2), 8  }
   0x8   : > { %s952_s8 = smov (!%p188_p2), 16   ;;  %s953_s9 = smov (!%p188_p2), 24  }
   0xd   : > { %s1090_s16 = smov (!%p222_p3, %s816_s16), 1 }
   0xe   : > { %s993_s17 = sshll.u32 %s1090_s16, 2  ;;  %s236_s26 = scalar_lea.vmem %s1087_s3, %s1090_s16 }
   0xf   : > { %s229_s20 = scalar_lea.vmem %s1085_s1, %s993_s17  ;;  %s225_s23 = scalar_lea.vmem %s1084_s0, %s993_s17  ;;  %v1011_v5 = vld [vmem:[%s236_s26] ss:$0 sm:$0xff] }
  0x10   : > { %v244_v1 = vld [vmem:[%s229_s20] sm:$0xf]  ;;  %s233_s6 = scalar_lea.vmem %s1086_s2, %s993_s17  ;;  %s240_s12 = scalar_lea.vmem %s1088_s4, %s993_s17 }
  0x11   : > { %v251_v2 = vsel %vm246_vm1, %v244_v1, 0  ;;  %v243_v3 = vld [vmem:[%s225_s23] sm:$0xf]  ;;  %v829_v12 = vcombine.low %v244_v1, %v244_v1 }
  0x12   : > { %856 = vmatpush3.bf16.xpose.msra.mxu0 %v251_v2  ;;  %v828_v13 = vcombine.low %v243_v3, %v243_v3  ;;  %v1025_v19 = vld [vmem:[%s233_s6] sm:$0xf] }
  0x13   : > { %873 = vmatprep.subr.bf16.mxu0 %v946_v0  ;;  %369 = vrot.lane.b32.xlu1 %v829_v12, %s948_s27  ;;  %v318_v20 = vsel %vm316_vm2, %v1025_v19, 0 }
  0x14   : > { %862 = vmatpush3.bf16.msra.mxu1 %v318_v20 }
  0x15   : > { %867 = vmatprep.subr.bf16.mxu1 %v946_v0 }
  0x17   : > { %364 = vrot.lane.b32.xlu1 %v828_v13, %s948_s27 }
  0x19   : > { %858 = vmatmul.mubr.msk.bf16.vlgmr.msra.gmra.mrb[0].mxu0 %vm246_vm1, %v243_v3 }
  0x1a   : > { %875 = vmatprep.mubr.msk.bf16.mxu0 %vm947_vm0, %v946_v0 }
  0x1b   : > { %483 = vrot.lane.b32.xlu1 %v828_v13, %s949_s28 }
  0x1f   : > { %598 = vrot.lane.b32.xlu1 %v829_v12, %s950_s29 }
  0x23   : > { %596 = vrot.lane.b32.xlu1 %v828_v13, %s950_s29 }
  0x85   : > { %v370_v23 = vpop.permute.xlu1 %369 }
  0x86   : > { %v375_v25 = vsel %vm246_vm1, %v370_v23, 0 }
  0x89   : > { %v365_v27 = vpop.permute.xlu1 %364 }
  0x8d   : > { %v484_v29 = vpop.permute.xlu1 %483 }
  0x91   : > { %v599_v31 = vpop.permute.xlu1 %598 }
  0x92   : > { %v604_v32 = vsel %vm246_vm1, %v599_v31, 0 }
  0x95   : > { %v597_v33 = vpop.permute.xlu1 %596 }
  0xec   : > { %v287_v4 = vpop.f32.mrb[0].mxu0 }
  0xed   : > { %v293_v6 = vmul.f32 0.35355338, %v287_v4  ;;  %v859_v7 = vpop.f32.mrb[1].mxu0 }
  0xee   : > { %v290_v8 = vpop.f32.mrb[2].mxu0 }
  0xef   : > { %v860_v9 = vpop.f32.mrb[3].mxu0  ;;  %v300_v10 = vadd.f32 %v1011_v5, %v293_v6 }
  0xf1   : > { %v301_v11 = vsel %vm246_vm1, %v300_v10, -inf }
  0xf2   : > { %302 = vmax.xlane.f32.xlu0 %v301_v11 }
 0x17f   : > { %v303_v14 = vpop.xlane.xlu0 %302 }
 0x180   : > { %v304_v15 = vsub.f32 %v300_v10, %v303_v14 }
 0x182   : > { %v305_v16 = vmul.f32 1.442695, %v304_v15 }
 0x184   : > { %922 = vpow2.f32 %v305_v16 }
 0x18e   : > { %v923_v17 = vpop.eup %922 }
 0x18f   : > { %v307_v18 = vsel %vm246_vm1, %v923_v17, 0.0 }
 0x190   : > { %308 = vadd.xlane.f32.xlu0 %v307_v18 }
 0x1a6   : > { %485 = vrot.lane.b32.xlu0 %v829_v12, %s949_s28 }
 0x21d   : > { %v309_v21 = vpop.xlane.xlu0 %308 }
 0x21e   : > { %924 = vrcp.f32 %v309_v21 }
 0x221   : > { %v486_v28 = vpop.permute.xlu0 %485 }
 0x222   : > { %v491_v30 = vsel %vm246_vm1, %v486_v28, 0 }
 0x228   : > { %v925_v22 = vpop.eup %924 }
 0x229   : > { %v311_v24 = vmul.f32 %v925_v22, %v923_v17 }
 0x22b   : > { %v312_v26 = vpack.c.bf16 %v311_v24, %v311_v24 }
 0x22d   : > { %864 = vmatmul.mubr.msk.bf16.vlgmr.msra.gmra.mrb[0].mxu1 %vm246_vm1, %v312_v26 }
 0x22e   : > { %868 = vmatpush3.bf16.xpose.msra.mxu1 %v375_v25  ;;  %869 = vmatprep.mubr.msk.bf16.mxu1 %vm947_vm0, %v946_v0 }
 0x22f   : > { %879 = vmatprep.subr.bf16.mxu1 %v946_v0 }
 0x235   : > { %870 = vmatmul.mubr.msk.bf16.vlgmr.msra.gmra.mrb[4].mxu1 %vm246_vm1, %v365_v27 }
 0x236   : > { %880 = vmatpush3.bf16.xpose.msra.mxu1 %v491_v30  ;;  %881 = vmatprep.mubr.msk.bf16.mxu1 %vm947_vm0, %v946_v0 }
 0x237   : > { %891 = vmatprep.subr.bf16.mxu1 %v946_v0 }
 0x23d   : > { %882 = vmatmul.mubr.msk.bf16.vlgmr.msra.gmra.mrb[8].mxu1 %vm246_vm1, %v484_v29 }
 0x23e   : > { %892 = vmatpush3.bf16.xpose.msra.mxu1 %v604_v32  ;;  %893 = vmatprep.mubr.msk.bf16.mxu1 %vm947_vm0, %v946_v0 }
 0x245   : > { %894 = vmatmul.mubr.msk.bf16.vlgmr.msra.gmra.mrb[12].mxu1 %vm246_vm1, %v597_v33 }
 0x300   : > { %v1046_v34 = vpop.f32.mrb[0].mxu1 }
 0x301   : > { %v865_v35 = vpop.f32.mrb[1].mxu1 }
 0x302   : > { %v357_v36 = vpop.f32.mrb[2].mxu1 }
 0x303   : > { %v866_v37 = vpop.f32.mrb[3].mxu1 }
 0x308   : > { %v411_v38 = vpop.f32.mrb[4].mxu1 }
 0x309   : > { %v417_v39 = vmul.f32 0.35355338, %v411_v38  ;;  %v871_v40 = vpop.f32.mrb[5].mxu1 }
 0x30a   : > { %v414_v41 = vpop.f32.mrb[6].mxu1 }
 0x30b   : > { %v872_v42 = vpop.f32.mrb[7].mxu1  ;;  %v418_v43 = vadd.f32 %v1011_v5, %v417_v39 }
 0x30d   : > { %v419_v44 = vsel %vm246_vm1, %v418_v43, -inf }
 0x30e   : > { %420 = vmax.xlane.f32.xlu1 %v419_v44 }
 0x310   : > { %v527_v45 = vpop.f32.mrb[8].mxu1 }
 0x311   : > { %v533_v46 = vmul.f32 0.35355338, %v527_v45  ;;  %v883_v47 = vpop.f32.mrb[9].mxu1 }
 0x312   : > { %v530_v48 = vpop.f32.mrb[10].mxu1 }
 0x313   : > { %v534_v49 = vadd.f32 %v1011_v5, %v533_v46  ;;  %v884_v50 = vpop.f32.mrb[11].mxu1  ;;  %v360_v46 = vpack.c.bf16 %v1046_v34, %v1046_v34 }
 0x315   : > { %v535_v51 = vsel %vm246_vm1, %v534_v49, -inf }
 0x316   : > { %536 = vmax.xlane.f32.xlu0 %v535_v51 }
 0x318   : > { %v640_v52 = vpop.f32.mrb[12].mxu1 }
 0x319   : > { %v646_v53 = vmul.f32 0.35355338, %v640_v52  ;;  %v895_v54 = vpop.f32.mrb[13].mxu1 }
 0x31a   : > { %v643_v55 = vpop.f32.mrb[14].mxu1 }
 0x31b   : > { %v647_v56 = vadd.f32 %v1011_v5, %v646_v53  ;;  %v896_v57 = vpop.f32.mrb[15].mxu1  ;;  %v831_v5 = vcombine.low %v1025_v19, %v1025_v19 }
 0x31d   : > { %v648_v58 = vsel %vm246_vm1, %v647_v56, -inf }
 0x31e   : > { %649 = vmax.xlane.f32.xlu1 %v648_v58 }
 0x39b   : > { %v421_v59 = vpop.xlane.xlu1 %420 }
 0x39c   : > { %v422_v60 = vsub.f32 %v418_v43, %v421_v59 }
 0x39e   : > { %v423_v61 = vmul.f32 1.442695, %v422_v60 }
 0x3a0   : > { %926 = vpow2.f32 %v423_v61 }
 0x3a3   : > { %v537_v62 = vpop.xlane.xlu0 %536 }
 0x3a4   : > { %v538_v63 = vsub.f32 %v534_v49, %v537_v62 }
 0x3a6   : > { %v539_v1 = vmul.f32 1.442695, %v538_v63 }
 0x3a8   : > { %928 = vpow2.f32 %v539_v1 }
 0x3aa   : > { %v927_v2 = vpop.eup %926 }
 0x3ab   : > { %v425_v3 = vsel %vm246_vm1, %v927_v2, 0.0  ;;  %v650_v7 = vpop.xlane.xlu1 %649 }
 0x3ac   : > { %426 = vadd.xlane.f32.xlu1 %v425_v3  ;;  %v651_v8 = vsub.f32 %v647_v56, %v650_v7 }
 0x3ae   : > { %v652_v9 = vmul.f32 1.442695, %v651_v8 }
 0x3b0   : > { %930 = vpow2.f32 %v652_v9 }
 0x3b2   : > { %v929_v4 = vpop.eup %928 }
 0x3b3   : > { %v541_v6 = vsel %vm246_vm1, %v929_v4, 0.0 }
 0x3b4   : > { %542 = vadd.xlane.f32.xlu0 %v541_v6 }
 0x3ba   : > { %v931_v10 = vpop.eup %930 }
 0x3bb   : > { %v654_v11 = vsel %vm246_vm1, %v931_v10, 0.0 }
 0x3bd   : > { %547 = vrot.lane.b32.xlu1 %v831_v5, %s949_s28 }
 0x3ca   : > { %434 = vrot.lane.b32.xlu0 %v831_v5, %s948_s27 }
 0x3e1   : > { %655 = vadd.xlane.f32.xlu1 %v654_v11 }
 0x3f2   : > { %660 = vrot.lane.b32.xlu1 %v831_v5, %s950_s29 }
 0x439   : > { %v427_v12 = vpop.xlane.xlu1 %426 }
 0x43a   : > { %932 = vrcp.f32 %v427_v12 }
 0x43d   : > { %v548_v18 = vpop.permute.xlu1 %547 }
 0x43e   : > { %v553_v20 = vsel %vm316_vm2, %v548_v18, 0 }
 0x441   : > { %v543_v13 = vpop.xlane.xlu0 %542 }
 0x442   : > { %934 = vrcp.f32 %v543_v13 }
 0x444   : > { %v933_v14 = vpop.eup %932 }
 0x445   : > { %v429_v15 = vmul.f32 %v933_v14, %v927_v2  ;;  %v435_v16 = vpop.permute.xlu0 %434 }
 0x446   : > { %v440_v17 = vsel %vm316_vm2, %v435_v16, 0 }
 0x447   : > { %874 = vmatpush3.bf16.msra.mxu0 %v440_v17  ;;  %v430_v19 = vpack.c.bf16 %v429_v15, %v429_v15 }
 0x448   : > { %885 = vmatprep.subr.bf16.mxu0 %v946_v0 }
 0x44a   : > { %876 = vmatmul.mubr.msk.bf16.vlgmr.msra.gmra.mrb[4].mxu0 %vm246_vm1, %v430_v19 }
 0x44b   : > { %886 = vmatpush3.bf16.msra.mxu0 %v553_v20  ;;  %887 = vmatprep.mubr.msk.bf16.mxu0 %vm947_vm0, %v946_v0 }
 0x44c   : > { %v935_v21 = vpop.eup %934  ;;  %897 = vmatprep.subr.bf16.mxu0 %v946_v0 }
 0x44d   : > { %v545_v22 = vmul.f32 %v935_v21, %v929_v4 }
 0x44f   : > { %v546_v23 = vpack.c.bf16 %v545_v22, %v545_v22 }
 0x452   : > { %888 = vmatmul.mubr.msk.bf16.vlgmr.msra.gmra.mrb[8].mxu0 %vm246_vm1, %v546_v23 }
 0x453   : > { %899 = vmatprep.mubr.msk.bf16.mxu0 %vm947_vm0, %v946_v0 }
 0x46e   : > { %v656_v24 = vpop.xlane.xlu1 %655 }
 0x46f   : > { %936 = vrcp.f32 %v656_v24 }
 0x472   : > { %v661_v25 = vpop.permute.xlu1 %660 }
 0x473   : > { %v666_v26 = vsel %vm316_vm2, %v661_v25, 0 }
 0x474   : > { %898 = vmatpush3.bf16.msra.mxu0 %v666_v26 }
 0x479   : > { %v937_v27 = vpop.eup %936 }
 0x47a   : > { %v658_v28 = vmul.f32 %v937_v27, %v931_v10 }
 0x47c   : > { %v659_v29 = vpack.c.bf16 %v658_v28, %v658_v28 }
 0x47e   : > { %900 = vmatmul.mubr.msk.bf16.vlgmr.msra.gmra.mrb[12].mxu0 %vm246_vm1, %v659_v29 }
 0x51d   : > { %v476_v30 = vpop.f32.mrb[4].mxu0 }
 0x51e   : > { %v482_v31 = vpack.c.bf16 %v476_v30, %v476_v30  ;;  %v877_v32 = vpop.f32.mrb[5].mxu0 }
 0x51f   : > { %v479_v33 = vpop.f32.mrb[6].mxu0 }
 0x520   : > { %710 = vrot.lane.b32.xlu0 %v482_v31, %s951_s7  ;;  %v878_v35 = vpop.f32.mrb[7].mxu0 }
 0x525   : > { %v589_v36 = vpop.f32.mrb[8].mxu0 }
 0x526   : > { %v595_v0 = vpack.c.bf16 %v589_v36, %v589_v36  ;;  %v889_v37 = vpop.f32.mrb[9].mxu0 }
 0x527   : > { %v592_v38 = vpop.f32.mrb[10].mxu0 }
 0x528   : > { %713 = vrot.lane.b32.xlu1 %v595_v0, %s952_s8  ;;  %v890_v39 = vpop.f32.mrb[11].mxu0 }
 0x551   : > { %v702_v40 = vpop.f32.mrb[12].mxu0 }
 0x552   : > { %v708_v41 = vpack.c.bf16 %v702_v40, %v702_v40  ;;  %v901_v42 = vpop.f32.mrb[13].mxu0 }
 0x553   : > { %v705_v43 = vpop.f32.mrb[14].mxu0 }
 0x554   : > { %716 = vrot.lane.b32.xlu0 %v708_v41, %s953_s9  ;;  %v902_v44 = vpop.f32.mrb[15].mxu0 }
 0x592   : > { %v711_v45 = vpop.permute.xlu0 %710 }
 0x593   : > { %v720_v48 = vsel %vm246_vm1, %v360_v46, %v711_v45 }
 0x59a   : > { %v714_v47 = vpop.permute.xlu1 %713 }
 0x59b   : > { %v723_v49 = vsel %vm721_vm3, %v720_v48, %v714_v47 }
 0x5c6   : > { %v717_v50 = vpop.permute.xlu0 %716 }
 0x5c7   : > { %v726_v51 = vsel %vm724_vm4, %v723_v49, %v717_v50 }
 0x5c8   : > { %729 = vst.msk [vmem:[%s240_s12] sm:$0xf] %vm728_vm5, %v726_v51 }
 0x5c9 PF: > { %s14_s15 = sadd.s32 1, %s944_s15  }
 0x5ca   : > { %p11_p4 = scmp.ge.s32.totalorder %s14_s15, 4  }
 0x5cc   :  { %13 = sbr.rel (!%p11_p4) target bundleno = 1 (0x1), region = 75 }

// kernel: bert_classifier_forward.13
= control target key start
LH: loop header
LB: loop body
LE: loop exit
PB: predicated region body
PF: predicated region fallthrough
CT: control target
= control target key end

     0   :  { %vm31_vm0 = vcmask 261120   ;;  %v396_v0 = vmov 0.0   ;;  %vm397_vm1 = vmmov 0   ;;  %vm304_vm2 = vcmask 257024   ;;  %s501_s1 = inlined_call_operand.vmem [shape: bf16[32,128], index: 1, kind: input, shape index: {}]   ;;  %s502_s3 = inlined_call_operand.vmem [shape: bf16[128,32], index: 3, kind: input, shape index: {}]   ;;  %s503_s0 = inlined_call_operand.vmem [shape: bf16[16,32], index: 0, kind: input, shape index: {}]   ;;  %s504_s2 = inlined_call_operand.vmem [shape: f32[1,128], index: 2, kind: input, shape index: {}]   ;;  %s505_s4 = inlined_call_operand.vmem [shape: f32[1,32], index: 4, kind: input, shape index: {}]   ;;  %s506_s5 = inlined_call_operand.vmem [shape: f32[1,32], index: 5, kind: input, shape index: {}]   ;;  %s507_s6 = inlined_call_operand.vmem [shape: f32[1,32], index: 6, kind: input, shape index: {}]   ;;  %s508_s7 = inlined_call_operand.vmem [shape: bf16[16,32], index: 7, kind: output, shape index: {}]  }
   0x1   :  { %347 = vmatprep.subr.bf16.mxu0 %v396_v0  ;;  %v377_v1 = vld [vmem:[%s501_s1] sm:$0xff]   ;;  %351 = vmatprep.mubr.msk.bf16.mxu0 %vm397_vm1, %v396_v0  ;;  %32 = vst.msk [vmem:[#allocation2] sm:$0xff] %vm31_vm0, %v396_v0  ;;  %33 = vst.msk [vmem:[#allocation2 + $0x8] sm:$0xff] %vm31_vm0, %v396_v0  ;;  %v378_v2 = vld [vmem:[%s501_s1 + $0x8] sm:$0xff]  }
   0x2   :  { %355 = vmatprep.subr.bf16.mxu1 %v396_v0  ;;  %371 = vmatprep.mubr.msk.bf16.mxu1 %vm397_vm1, %v396_v0  ;;  %v380_v3 = vld [vmem:[%s502_s3] sm:$0xff]   ;;  %v381_v5 = vld [vmem:[%s502_s3 + $0x8] sm:$0xff]   ;;  %v382_v6 = vld [vmem:[%s502_s3 + $0x10] sm:$0xff]  }
   0x3   :  { %348 = vmatpush3.bf16.msra.mxu0 %v377_v1  ;;  %v379_v4 = vld [vmem:[%s503_s0] sm:$0xff]   ;;  %356 = vmatpush3.bf16.msra.mxu1 %v380_v3  ;;  %v383_v7 = vld [vmem:[%s502_s3 + $0x18] sm:$0xff]   ;;  %v385_v9 = vld [vmem:[%s502_s3 + $0x28] sm:$0xff]  }
   0x4   :  { %349 = vmatprep.subr.bf16.mxu0 %v396_v0  ;;  %357 = vmatprep.subr.bf16.mxu1 %v396_v0  ;;  %v384_v8 = vld [vmem:[%s502_s3 + $0x20] sm:$0xff]   ;;  %v386_v10 = vld [vmem:[%s502_s3 + $0x30] sm:$0xff]   ;;  %v387_v11 = vld [vmem:[%s502_s3 + $0x38] sm:$0xff]  }
   0x5   :  { %v311_v12 = vld [vmem:[%s504_s2] ss:$0 sm:$0xff] }
   0x6   :  { %v332_v38 = vld [vmem:[%s503_s0] sm:$0xff]  }
   0x7   :  { %350 = vmatpush3.bf16.msra.mxu0 %v378_v2  ;;  %358 = vmatpush3.bf16.msra.mxu1 %v381_v5  ;;  %v324_v39 = vld [vmem:[%s505_s4] ss:$0 sm:$0xff]  ;;  %v333_v40 = vunpack.c.l.bf16 %v332_v38  ;;  %v334_v43 = vunpack.c.h.bf16 %v332_v38 }
   0x8   :  { %359 = vmatprep.subr.bf16.mxu1 %v396_v0  ;;  %v119_v30 = vld [vmem:[#allocation2] sm:$0xff]  ;;  %v120_v32 = vld [vmem:[#allocation2 + $0x8] sm:$0xff] }
   0x9   :  { %v325_v3 = vld [vmem:[%s506_s5] ss:$0 sm:$0xff] }
   0xa   :  { %352 = vmatmul.mubr.msk.bf16.vlgmr.msra.gmra.mrb[0].mxu0 %vm31_vm0, %v379_v4  ;;  %v326_v5 = vld [vmem:[%s507_s6] ss:$0 sm:$0xff] }
   0xb   :  { %360 = vmatpush3.bf16.msra.mxu1 %v382_v6 }
   0xc   :  { %361 = vmatprep.subr.bf16.mxu1 %v396_v0 }
   0xf   :  { %362 = vmatpush3.bf16.msra.mxu1 %v383_v7 }
  0x10   :  { %363 = vmatprep.subr.bf16.mxu1 %v396_v0 }
  0x13   :  { %364 = vmatpush3.bf16.msra.mxu1 %v384_v8 }
  0x14   :  { %365 = vmatprep.subr.bf16.mxu1 %v396_v0 }
  0x17   :  { %366 = vmatpush3.bf16.msra.mxu1 %v385_v9 }
  0x18   :  { %367 = vmatprep.subr.bf16.mxu1 %v396_v0 }
  0x1b   :  { %368 = vmatpush3.bf16.msra.mxu1 %v386_v10 }
  0x1c   :  { %369 = vmatprep.subr.bf16.mxu1 %v396_v0 }
  0x1f   :  { %370 = vmatpush3.bf16.msra.mxu1 %v387_v11 }
  0xdd   :  { %v102_v13 = vpop.f32.mrb[0].mxu0 }
  0xde   :  { %v103_v14 = vadd.f32 %v311_v12, %v102_v13  ;;  %v353_v15 = vpop.f32.mrb[1].mxu0 }
  0xdf   :  { %v105_v16 = vpop.f32.mrb[2].mxu0 }
  0xe0   :  { %v111_v17 = vmul.f32 0.70710677, %v103_v14  ;;  %v106_v18 = vadd.f32 %v311_v12, %v105_v16  ;;  %v354_v19 = vpop.f32.mrb[3].mxu0  ;;  %v109_v24 = vmul.f32 0.5, %v103_v14 }
  0xe2   :  { %388 = verf.f32 %v111_v17  ;;  %v112_v20 = vmul.f32 0.70710677, %v106_v18  ;;  %v110_v25 = vmul.f32 0.5, %v106_v18 }
  0xe4   :  { %390 = verf.f32 %v112_v20 }
  0xec   :  { %v389_v21 = vpop.eup %388 }
  0xed   :  { %v115_v22 = vadd.f32 1.0, %v389_v21 }
  0xee   :  { %v391_v23 = vpop.eup %390 }
  0xef   :  { %v116_v26 = vadd.f32 1.0, %v391_v23  ;;  %v117_v27 = vmul.f32 %v115_v22, %v109_v24 }
  0xf1   :  { %v118_v28 = vmul.f32 %v116_v26, %v110_v25 }
  0xf3   :  { %v121_v29 = vpack.c.bf16 %v118_v28, %v117_v27 }
  0xf5   :  { %372 = vmatmul.mubr.bf16.vlgmr.msra.gmra.mrb[0].mxu1 %v121_v29 }
 0x1c8   :  { %v220_v31 = vpop.f32.mrb[0].mxu1 }
 0x1c9   :  { %v227_v33 = vadd.f32 %v220_v31, %v119_v30  ;;  %v373_v34 = vpop.f32.mrb[1].mxu1 }
 0x1ca   :  { %v223_v35 = vpop.f32.mrb[2].mxu1 }
 0x1cb   :  { %229 = vst.msk [vmem:[#allocation2] sm:$0xff] %vm31_vm0, %v227_v33  ;;  %v228_v36 = vadd.f32 %v223_v35, %v120_v32  ;;  %v374_v37 = vpop.f32.mrb[3].mxu1 }
 0x1cd   :  { %230 = vst.msk [vmem:[#allocation2 + $0x8] sm:$0xff] %vm31_vm0, %v228_v36 }
 0x1d2   :  { %v234_v41 = vld [vmem:[#allocation2] sm:$0xff] }
 0x1d3   :  { %v243_v42 = vadd.f32 %v324_v39, %v234_v41 }
 0x1d4   :  { %v235_v44 = vld [vmem:[#allocation2 + $0x8] sm:$0xff] }
 0x1d5   :  { %v249_v45 = vadd.f32 %v333_v40, %v243_v42  ;;  %v244_v46 = vadd.f32 %v324_v39, %v235_v44 }
 0x1d7   :  { %v251_v47 = vsel %vm31_vm0, %v249_v45, 0.0  ;;  %v250_v48 = vadd.f32 %v334_v43, %v244_v46 }
 0x1d8   :  { %252 = vadd.xlane.f32.xlu0 %v251_v47 }
 0x1d9   :  { %v254_v49 = vsel %vm31_vm0, %v250_v48, 0.0 }
 0x1dc   :  { %255 = vadd.xlane.f32.xlu0 %v254_v49 }
 0x265   :  { %v253_v50 = vpop.xlane.xlu0 %252 }
 0x266   :  { %v258_v51 = vmul.f32 0.03125, %v253_v50 }
 0x268   :  { %v260_v52 = vsub.f32 %v249_v45, %v258_v51 }
 0x269   :  { %v256_v53 = vpop.xlane.xlu0 %255 }
 0x26a   :  { %v259_v54 = vmul.f32 0.03125, %v256_v53  ;;  %v262_v55 = vmul.f32 %v260_v52, %v260_v52 }
 0x26c   :  { %v261_v56 = vsub.f32 %v250_v48, %v259_v54  ;;  %v264_v57 = vsel %vm31_vm0, %v262_v55, 0.0 }
 0x26d   :  { %265 = vadd.xlane.f32.xlu1 %v264_v57 }
 0x26e   :  { %v263_v58 = vmul.f32 %v261_v56, %v261_v56 }
 0x270   :  { %v267_v59 = vsel %vm31_vm0, %v263_v58, 0.0 }
 0x271   :  { %268 = vadd.xlane.f32.xlu1 %v267_v59 }
 0x2fa   :  { %v266_v60 = vpop.xlane.xlu1 %265 }
 0x2fb   :  { %v270_v61 = vmul.f32 0.03125, %v266_v60 }
 0x2fd   :  { %v272_v62 = vadd.f32 1e-12, %v270_v61 }
 0x2fe   :  { %v269_v63 = vpop.xlane.xlu1 %268 }
 0x2ff   :  { %392 = vrsqrt.f32 %v272_v62  ;;  %v271_v0 = vmul.f32 0.03125, %v269_v63 }
 0x301   :  { %v273_v1 = vadd.f32 1e-12, %v271_v0 }
 0x303   :  { %394 = vrsqrt.f32 %v273_v1 }
 0x309   :  { %v393_v2 = vpop.eup %392 }
 0x30a   :  { %v276_v4 = vmul.f32 %v393_v2, %v260_v52 }
 0x30c   :  { %v285_v6 = vmul.f32 %v325_v3, %v276_v4 }
 0x30d   :  { %v395_v7 = vpop.eup %394 }
 0x30e   :  { %v294_v8 = vadd.f32 %v326_v5, %v285_v6  ;;  %v277_v9 = vmul.f32 %v395_v7, %v261_v56 }
 0x310   :  { %v329_v10 = vpack.c.bf16 %v294_v8, %v294_v8  ;;  %v286_v11 = vmul.f32 %v325_v3, %v277_v9 }
 0x312   :  { %305 = vst.msk [vmem:[%s508_s7] sm:$0xf] %vm304_vm2, %v329_v10  ;;  %v295_v12 = vadd.f32 %v326_v5, %v286_v11 }
 0x314   :  { %v330_v13 = vpack.c.bf16 %v295_v12, %v295_v12 }
 0x316   :  { %306 = vst.msk [vmem:[%s508_s7 + $0x4] sm:$0xf] %vm304_vm2, %v330_v13 }

</bundles_post_ra>
